<compile_context>
chip_gen: v5e
topology: v5e:2x2
jax: 0.10.0
libtpu: 0.0.40
codegen_flags: <defaults>
</compile_context>

<pallas_src>
import math

import jax
import jax.numpy as jnp
from jax.experimental import pallas as pl
from jax.experimental.pallas import tpu as pltpu  # noqa: F401  (kept for parity with pallas_call conventions)

# ----------------------- small config (scaled-down BERT) ---------------------
EMBED_DIM = 64        # embedding_dim   (1536 in the original module)
HIDDEN = 32           # hidden_dim      (768)
SEQ = 4               # sequence_length (4)
LSTM_UNITS = 16       # lstm_units      (256)
N_LAYERS = 2          # BERT encoder layers
N_HEADS = 2
HEAD_DIM = HIDDEN // N_HEADS
INTERMEDIATE = 64     # BERT FFN intermediate size
MAX_POS = 16
LN_EPS = 1e-12        # BERT LayerNorm eps
BATCH = 2

_INV_SQRT_HD = 1.0 / math.sqrt(HEAD_DIM)
_INV_SQRT2 = 1.0 / math.sqrt(2.0)


# --------------------------- in-kernel helpers --------------------------------
def _ln(h, g, b):
    """Row-wise LayerNorm over the last axis (BERT eps, biased variance)."""
    mu = jnp.mean(h, axis=-1, keepdims=True)
    d = h - mu
    var = jnp.mean(d * d, axis=-1, keepdims=True)
    return d * jax.lax.rsqrt(var + LN_EPS) * g + b


def _gelu(y):
    """Exact (erf-based) GELU, matching HF BERT's 'gelu'."""
    return 0.5 * y * (1.0 + jax.lax.erf(y * _INV_SQRT2))


# ------------------------------ fused kernel ----------------------------------
def _forward_kernel(
    # inputs
    x_ref, wa_ref, bemb_ref, eg_ref, eb_ref,
    wqkv_ref, bqkv_ref, wo_ref, bo_ref, g1_ref, b1_ref,
    wi_ref, bi_ref, wf_ref, bf_ref, g2_ref, b2_ref,
    wih_ref, whh_ref, lb_ref, wout_ref, bout_ref,
    # output
    o_ref,
):
    f32 = jnp.float32
    B = x_ref.shape[0]
    H, T, U, NH, HD = HIDDEN, SEQ, LSTM_UNITS, N_HEADS, HEAD_DIM

    # ---- 1) embedding adapter + BERT embeddings ------------------------------
    # bemb = adapter bias + position + token-type embeddings, pre-flattened to
    # one (1, T*H) row at pack time -> single matmul + single VPU add.
    ad = jnp.dot(x_ref[...], wa_ref[...], preferred_element_type=f32) + bemb_ref[...]   # (B, T*H)
    # Assemble batch-major (B*T, H) entirely in vregs (lane slices + concat);
    # no VMEM scratch, no masked row stores.
    x2d = jnp.concatenate(
        [ad[bb:bb + 1, tt * H:(tt + 1) * H] for bb in range(B) for tt in range(T)],
        axis=0)                                                                         # (B*T, H)
    x2d = _ln(x2d, eg_ref[...], eb_ref[...])

    # ---- 2) BERT encoder layers (fused QKV, batched attention over B) --------
    for li in range(N_LAYERS):
        w_qkv, b_qkv = wqkv_ref[li], bqkv_ref[li]
        w_o, b_o = wo_ref[li], bo_ref[li]
        ln1g, ln1b = g1_ref[li], b1_ref[li]
        w_int, b_int = wi_ref[li], bi_ref[li]
        w_ffn, b_ffn = wf_ref[li], bf_ref[li]
        ln2g, ln2b = g2_ref[li], b2_ref[li]

        qkv = jnp.dot(x2d, w_qkv, preferred_element_type=f32) + b_qkv                  # (B*T, 3H)
        # (B, T, 3H) via leading-dim stack of contiguous per-batch row blocks.
        qkv3 = jnp.stack([qkv[bb * T:(bb + 1) * T, :] for bb in range(B)], axis=0)     # (B, T, 3H)

        # Per-head batched (over B) score matmuls; ONE softmax over all
        # batch*head blocks; per-head batched PV matmuls.
        s_parts, v_parts = [], []
        for hh in range(NH):
            lo = hh * HD
            qh = qkv3[:, :, lo:lo + HD]                                                 # (B, T, HD)
            kh = qkv3[:, :, H + lo:H + lo + HD]
            vh = qkv3[:, :, 2 * H + lo:2 * H + lo + HD]
            s_parts.append(jnp.einsum('bqd,bkd->bqk', qh, kh,
                                      preferred_element_type=f32) * _INV_SQRT_HD)       # (B, T, T)
            v_parts.append(vh)
        s_all = jnp.concatenate(s_parts, axis=1)                                        # (B, NH*T, T)
        s_all = s_all - jnp.max(s_all, axis=-1, keepdims=True)
        p_all = jnp.exp(s_all)
        p_all = p_all / jnp.sum(p_all, axis=-1, keepdims=True)                          # exact softmax
        ctx3 = jnp.concatenate(
            [jnp.einsum('bqk,bkd->bqd', p_all[:, hh * T:(hh + 1) * T, :], v_parts[hh],
                        preferred_element_type=f32) for hh in range(NH)],
            axis=-1)                                                                    # (B, T, H)
        attn2d = jnp.concatenate([ctx3[bb] for bb in range(B)], axis=0)                 # (B*T, H)

        # Single output-projection matmul for all batches/heads + residual + LN1.
        attn_out = jnp.dot(attn2d, w_o, preferred_element_type=f32) + b_o
        h1 = _ln(attn_out + x2d, ln1g, ln1b)

        # FFN + residual + LN2.
        inter = _gelu(jnp.dot(h1, w_int, preferred_element_type=f32) + b_int)           # (B*T, I)
        ffn = jnp.dot(inter, w_ffn, preferred_element_type=f32) + b_ffn                 # (B*T, H)
        x2d = _ln(ffn + h1, ln2g, ln2b)

    # ---- 3) LSTM decoder (batched over B, hoisted input proj) + output -------
    # Gate columns were repacked at init to [i, f, o, g]; bias pre-summed.
    gx = jnp.dot(x2d, wih_ref[...], preferred_element_type=f32) + lb_ref[...]           # (B*T, 4U)
    # Pre-extract per-timestep (B, 4U) slices before the serial recurrence.
    gx_t = [jnp.concatenate([gx[bb * T + tt:bb * T + tt + 1, :] for bb in range(B)],
                            axis=0) for tt in range(T)]                                 # T x (B, 4U)
    whh = whh_ref[...]                                                                  # (U, 4U)
    wout = wout_ref[...]                                                                # (T*U, E)

    h_st = jnp.zeros((B, U), f32)
    c_st = jnp.zeros((B, U), f32)
    acc = jnp.zeros((B, EMBED_DIM), f32)
    for tt in range(T):
        gates = gx_t[tt] + jnp.dot(h_st, whh, preferred_element_type=f32)               # (B, 4U)
        sg = jax.nn.sigmoid(gates[:, 0:3 * U])      # one EUP push for i, f, o
        g_g = jnp.tanh(gates[:, 3 * U:4 * U])       # one EUP push for g
        c_st = sg[:, U:2 * U] * c_st + sg[:, 0:U] * g_g
        h_st = sg[:, 2 * U:3 * U] * jnp.tanh(c_st)
        # Output Linear(lstm_units*seq -> embed) folded into the recurrence:
        # out = sum_t h_t @ Wout.T[t*U:(t+1)*U, :] + b_out
        acc = acc + jnp.dot(h_st, wout[tt * U:(tt + 1) * U, :],
                            preferred_element_type=f32)

    # Single (B, E) output store (no per-row masked stores).
    o_ref[...] = acc + bout_ref[...]


# ------------------------------ forward wrapper --------------------------------
def bert_autoencoder_forward(packed, x):
    b = x.shape[0]
    # No grid / BlockSpecs: single program, every (tiny) array whole-block
    # resident in VMEM. At real BERT sizes this would become a layer grid axis
    # with per-layer weight BlockSpecs (streamed, double-buffered).
    return pl.pallas_call(
        _forward_kernel,
        out_shape=jax.ShapeDtypeStruct((b, EMBED_DIM), jnp.float32),
    )(x, *packed)


# ------------------------------- parameters ------------------------------------
def init_params(key):
    """Parameters in PyTorch layout (nn.Linear weights are (out, in))."""
    keys = iter(jax.random.split(key, 128))

    def nrm(shape):
        return 0.02 * jax.random.normal(next(keys), shape, jnp.float32)

    p = {
        "adapter_w": nrm((HIDDEN * SEQ, EMBED_DIM)),
        "adapter_b": nrm((HIDDEN * SEQ,)),
        "pos_emb": nrm((MAX_POS, HIDDEN)),
        "type_emb": nrm((2, HIDDEN)),
        "emb_ln_g": jnp.ones((HIDDEN,), jnp.float32),
        "emb_ln_b": jnp.zeros((HIDDEN,), jnp.float32),
        "lstm_w_ih": nrm((4 * LSTM_UNITS, HIDDEN)),
        "lstm_w_hh": nrm((4 * LSTM_UNITS, LSTM_UNITS)),
        "lstm_b_ih": nrm((4 * LSTM_UNITS,)),
        "lstm_b_hh": nrm((4 * LSTM_UNITS,)),
        "out_w": nrm((EMBED_DIM, LSTM_UNITS * SEQ)),
        "out_b": nrm((EMBED_DIM,)),
    }
    layers = []
    for _ in range(N_LAYERS):
        layers.append({
            "wq": nrm((HIDDEN, HIDDEN)), "bq": nrm((HIDDEN,)),
            "wk": nrm((HIDDEN, HIDDEN)), "bk": nrm((HIDDEN,)),
            "wv": nrm((HIDDEN, HIDDEN)), "bv": nrm((HIDDEN,)),
            "wo": nrm((HIDDEN, HIDDEN)), "bo": nrm((HIDDEN,)),
            "ln1_g": jnp.ones((HIDDEN,), jnp.float32),
            "ln1_b": jnp.zeros((HIDDEN,), jnp.float32),
            "wi": nrm((INTERMEDIATE, HIDDEN)), "bi": nrm((INTERMEDIATE,)),
            "wf": nrm((HIDDEN, INTERMEDIATE)), "bf": nrm((HIDDEN,)),
            "ln2_g": jnp.ones((HIDDEN,), jnp.float32),
            "ln2_b": jnp.zeros((HIDDEN,), jnp.float32),
        })
    p["layers"] = layers
    return p


def pack_params(p):
    """One-time packing (off the per-forward hot path):
    transpose to (in,out), fuse QKV, stack layers, pre-sum adapter bias +
    pos + token-type embeddings into one (1, T*H) row, pre-sum LSTM biases,
    and repack LSTM gate columns to [i, f, o, g] (sigmoid gates contiguous)."""
    L = p["layers"]
    wqkv = jnp.stack([jnp.concatenate([l["wq"].T, l["wk"].T, l["wv"].T], axis=1)
                      for l in L])                                    # (L, H, 3H)
    bqkv = jnp.stack([jnp.concatenate([l["bq"], l["bk"], l["bv"]]).reshape(1, -1)
                      for l in L])                                    # (L, 1, 3H)
    wo = jnp.stack([l["wo"].T for l in L])                            # (L, H, H)
    bo = jnp.stack([l["bo"].reshape(1, -1) for l in L])
    g1 = jnp.stack([l["ln1_g"].reshape(1, -1) for l in L])
    b1 = jnp.stack([l["ln1_b"].reshape(1, -1) for l in L])
    wi = jnp.stack([l["wi"].T for l in L])                            # (L, H, I)
    bi = jnp.stack([l["bi"].reshape(1, -1) for l in L])
    wf = jnp.stack([l["wf"].T for l in L])                            # (L, I, H)
    bf = jnp.stack([l["bf"].reshape(1, -1) for l in L])
    g2 = jnp.stack([l["ln2_g"].reshape(1, -1) for l in L])
    b2 = jnp.stack([l["ln2_b"].reshape(1, -1) for l in L])

    # adapter bias + pos + token-type(0) pre-summed, flattened to (1, T*H).
    pos_type = p["pos_emb"][:SEQ] + p["type_emb"][0][None, :]         # (T, H)
    emb_bias = (p["adapter_b"] + pos_type.reshape(-1)).reshape(1, -1)  # (1, T*H)

    U = LSTM_UNITS

    def _gate_cols_ifog(w):
        # columns in torch order [i, f, g, o] -> repack to [i, f, o, g]
        return jnp.concatenate(
            [w[:, 0:U], w[:, U:2 * U], w[:, 3 * U:4 * U], w[:, 2 * U:3 * U]], axis=1)

    lstm_w_ih = _gate_cols_ifog(p["lstm_w_ih"].T)                     # (H, 4U)
    lstm_w_hh = _gate_cols_ifog(p["lstm_w_hh"].T)                     # (U, 4U)
    lstm_bias = _gate_cols_ifog((p["lstm_b_ih"] + p["lstm_b_hh"]).reshape(1, -1))

    return (
        p["adapter_w"].T, emb_bias,
        p["emb_ln_g"].reshape(1, -1), p["emb_ln_b"].reshape(1, -1),
        wqkv, bqkv, wo, bo, g1, b1, wi, bi, wf, bf, g2, b2,
        lstm_w_ih, lstm_w_hh, lstm_bias,
        p["out_w"].T, p["out_b"].reshape(1, -1),
    )


# ------------------------------------ main --------------------------------------
if __name__ == "__main__":
    key = jax.random.PRNGKey(0)
    pkey, xkey = jax.random.split(key)
    params = init_params(pkey)
    packed = pack_params(params)                       # one-time weight packing
    x = jax.random.normal(xkey, (BATCH, EMBED_DIM), jnp.float32)

    fwd = jax.jit(bert_autoencoder_forward)
    out = jax.block_until_ready(fwd(packed, x))

    assert out.shape == (BATCH, EMBED_DIM), out.shape
    assert jnp.all(jnp.isfinite(out))
    print("KERNEL_OK")
</pallas_src>

<mosaic_0001>
module attributes {stable_mosaic.version = 11 : i64} {
  func.func @_forward_kernel(%arg0: memref<2x64xf32, #tpu.memory_space<vmem>>, %arg1: memref<64x128xf32, #tpu.memory_space<vmem>>, %arg2: memref<1x128xf32, #tpu.memory_space<vmem>>, %arg3: memref<1x32xf32, #tpu.memory_space<vmem>>, %arg4: memref<1x32xf32, #tpu.memory_space<vmem>>, %arg5: memref<2x32x96xf32, #tpu.memory_space<vmem>>, %arg6: memref<2x1x96xf32, #tpu.memory_space<vmem>>, %arg7: memref<2x32x32xf32, #tpu.memory_space<vmem>>, %arg8: memref<2x1x32xf32, #tpu.memory_space<vmem>>, %arg9: memref<2x1x32xf32, #tpu.memory_space<vmem>>, %arg10: memref<2x1x32xf32, #tpu.memory_space<vmem>>, %arg11: memref<2x32x64xf32, #tpu.memory_space<vmem>>, %arg12: memref<2x1x64xf32, #tpu.memory_space<vmem>>, %arg13: memref<2x64x32xf32, #tpu.memory_space<vmem>>, %arg14: memref<2x1x32xf32, #tpu.memory_space<vmem>>, %arg15: memref<2x1x32xf32, #tpu.memory_space<vmem>>, %arg16: memref<2x1x32xf32, #tpu.memory_space<vmem>>, %arg17: memref<32x64xf32, #tpu.memory_space<vmem>>, %arg18: memref<16x64xf32, #tpu.memory_space<vmem>>, %arg19: memref<1x64xf32, #tpu.memory_space<vmem>>, %arg20: memref<64x64xf32, #tpu.memory_space<vmem>>, %arg21: memref<1x64xf32, #tpu.memory_space<vmem>>, %arg22: memref<2x64xf32, #tpu.memory_space<vmem>>) attributes {dimension_semantics = [], scalar_prefetch = 0 : i64, scratch_operands = 0 : i64, tpu.core_type = #tpu.core_type<tc>} {
    %c0 = arith.constant 0 : index
    %c0_0 = arith.constant 0 : index
    %0 = vector.load %arg0[%c0, %c0_0] : memref<2x64xf32, #tpu.memory_space<vmem>>, vector<2x64xf32>
    %c0_1 = arith.constant 0 : index
    %c0_2 = arith.constant 0 : index
    %1 = vector.load %arg1[%c0_1, %c0_2] : memref<64x128xf32, #tpu.memory_space<vmem>>, vector<64x128xf32>
    %cst = arith.constant dense<0.000000e+00> : vector<2x128xf32>
    %2 = tpu.matmul %0, %1, %cst {dimension_numbers = #tpu.dot_dimension_numbers<[1], [0], [0], [1], [0, 0, 1, 1], [], []>} : vector<2x64xf32>, vector<64x128xf32>, vector<2x128xf32> -> vector<2x128xf32>
    %c0_3 = arith.constant 0 : index
    %c0_4 = arith.constant 0 : index
    %3 = vector.load %arg2[%c0_3, %c0_4] : memref<1x128xf32, #tpu.memory_space<vmem>>, vector<1x128xf32>
    %4 = vector.broadcast %3 : vector<1x128xf32> to vector<2x128xf32>
    %5 = arith.addf %2, %4 : vector<2x128xf32>
    %6 = vector.extract_strided_slice %5 {offsets = [0, 0], sizes = [1, 32], strides = [1, 1]} : vector<2x128xf32> to vector<1x32xf32>
    %7 = vector.extract_strided_slice %5 {offsets = [0, 32], sizes = [1, 32], strides = [1, 1]} : vector<2x128xf32> to vector<1x32xf32>
    %8 = vector.extract_strided_slice %5 {offsets = [0, 64], sizes = [1, 32], strides = [1, 1]} : vector<2x128xf32> to vector<1x32xf32>
    %9 = vector.extract_strided_slice %5 {offsets = [0, 96], sizes = [1, 32], strides = [1, 1]} : vector<2x128xf32> to vector<1x32xf32>
    %10 = vector.extract_strided_slice %5 {offsets = [1, 0], sizes = [1, 32], strides = [1, 1]} : vector<2x128xf32> to vector<1x32xf32>
    %11 = vector.extract_strided_slice %5 {offsets = [1, 32], sizes = [1, 32], strides = [1, 1]} : vector<2x128xf32> to vector<1x32xf32>
    %12 = vector.extract_strided_slice %5 {offsets = [1, 64], sizes = [1, 32], strides = [1, 1]} : vector<2x128xf32> to vector<1x32xf32>
    %13 = vector.extract_strided_slice %5 {offsets = [1, 96], sizes = [1, 32], strides = [1, 1]} : vector<2x128xf32> to vector<1x32xf32>
    %14 = tpu.concatenate %6, %7, %8, %9, %10, %11, %12, %13 in 0 : vector<1x32xf32>, vector<1x32xf32>, vector<1x32xf32>, vector<1x32xf32>, vector<1x32xf32>, vector<1x32xf32>, vector<1x32xf32>, vector<1x32xf32> -> vector<8x32xf32>
    %c0_5 = arith.constant 0 : index
    %c0_6 = arith.constant 0 : index
    %15 = vector.load %arg3[%c0_5, %c0_6] : memref<1x32xf32, #tpu.memory_space<vmem>>, vector<1x32xf32>
    %c0_7 = arith.constant 0 : index
    %c0_8 = arith.constant 0 : index
    %16 = vector.load %arg4[%c0_7, %c0_8] : memref<1x32xf32, #tpu.memory_space<vmem>>, vector<1x32xf32>
    %cst_9 = arith.constant dense<0.000000e+00> : vector<8xf32>
    %17 = vector.multi_reduction <add>, %14, %cst_9 [1] : vector<8x32xf32> to vector<8xf32>
    %18 = vector.shape_cast %17 : vector<8xf32> to vector<8x1xf32>
    %cst_10 = arith.constant 3.200000e+01 : f32
    %19 = vector.broadcast %cst_10 : f32 to vector<8x1xf32>
    %20 = arith.divf %18, %19 : vector<8x1xf32>
    %21 = vector.broadcast %20 : vector<8x1xf32> to vector<8x32xf32>
    %22 = arith.subf %14, %21 : vector<8x32xf32>
    %23 = arith.mulf %22, %22 : vector<8x32xf32>
    %cst_11 = arith.constant dense<0.000000e+00> : vector<8xf32>
    %24 = vector.multi_reduction <add>, %23, %cst_11 [1] : vector<8x32xf32> to vector<8xf32>
    %25 = vector.shape_cast %24 : vector<8xf32> to vector<8x1xf32>
    %cst_12 = arith.constant 3.200000e+01 : f32
    %26 = vector.broadcast %cst_12 : f32 to vector<8x1xf32>
    %27 = arith.divf %25, %26 : vector<8x1xf32>
    %cst_13 = arith.constant 9.99999996E-13 : f32
    %28 = vector.broadcast %cst_13 : f32 to vector<8x1xf32>
    %29 = arith.addf %27, %28 : vector<8x1xf32>
    %30 = math.rsqrt %29 : vector<8x1xf32>
    %31 = vector.broadcast %30 : vector<8x1xf32> to vector<8x32xf32>
    %32 = arith.mulf %22, %31 : vector<8x32xf32>
    %33 = vector.broadcast %15 : vector<1x32xf32> to vector<8x32xf32>
    %34 = arith.mulf %32, %33 : vector<8x32xf32>
    %35 = vector.broadcast %16 : vector<1x32xf32> to vector<8x32xf32>
    %36 = arith.addf %34, %35 : vector<8x32xf32>
    %c0_14 = arith.constant 0 : index
    %c0_15 = arith.constant 0 : index
    %c0_16 = arith.constant 0 : index
    %37 = vector.load %arg5[%c0_14, %c0_15, %c0_16] : memref<2x32x96xf32, #tpu.memory_space<vmem>>, vector<1x32x96xf32>
    %38 = vector.shape_cast %37 : vector<1x32x96xf32> to vector<32x96xf32>
    %c0_17 = arith.constant 0 : index
    %c0_18 = arith.constant 0 : index
    %c0_19 = arith.constant 0 : index
    %39 = vector.load %arg6[%c0_17, %c0_18, %c0_19] : memref<2x1x96xf32, #tpu.memory_space<vmem>>, vector<1x1x96xf32>
    %40 = vector.shape_cast %39 : vector<1x1x96xf32> to vector<1x96xf32>
    %c0_20 = arith.constant 0 : index
    %c0_21 = arith.constant 0 : index
    %c0_22 = arith.constant 0 : index
    %41 = vector.load %arg7[%c0_20, %c0_21, %c0_22] : memref<2x32x32xf32, #tpu.memory_space<vmem>>, vector<1x32x32xf32>
    %42 = vector.shape_cast %41 : vector<1x32x32xf32> to vector<32x32xf32>
    %c0_23 = arith.constant 0 : index
    %c0_24 = arith.constant 0 : index
    %c0_25 = arith.constant 0 : index
    %43 = vector.load %arg8[%c0_23, %c0_24, %c0_25] : memref<2x1x32xf32, #tpu.memory_space<vmem>>, vector<1x1x32xf32>
    %44 = vector.shape_cast %43 : vector<1x1x32xf32> to vector<1x32xf32>
    %c0_26 = arith.constant 0 : index
    %c0_27 = arith.constant 0 : index
    %c0_28 = arith.constant 0 : index
    %45 = vector.load %arg9[%c0_26, %c0_27, %c0_28] : memref<2x1x32xf32, #tpu.memory_space<vmem>>, vector<1x1x32xf32>
    %46 = vector.shape_cast %45 : vector<1x1x32xf32> to vector<1x32xf32>
    %c0_29 = arith.constant 0 : index
    %c0_30 = arith.constant 0 : index
    %c0_31 = arith.constant 0 : index
    %47 = vector.load %arg10[%c0_29, %c0_30, %c0_31] : memref<2x1x32xf32, #tpu.memory_space<vmem>>, vector<1x1x32xf32>
    %48 = vector.shape_cast %47 : vector<1x1x32xf32> to vector<1x32xf32>
    %c0_32 = arith.constant 0 : index
    %c0_33 = arith.constant 0 : index
    %c0_34 = arith.constant 0 : index
    %49 = vector.load %arg11[%c0_32, %c0_33, %c0_34] : memref<2x32x64xf32, #tpu.memory_space<vmem>>, vector<1x32x64xf32>
    %50 = vector.shape_cast %49 : vector<1x32x64xf32> to vector<32x64xf32>
    %c0_35 = arith.constant 0 : index
    %c0_36 = arith.constant 0 : index
    %c0_37 = arith.constant 0 : index
    %51 = vector.load %arg12[%c0_35, %c0_36, %c0_37] : memref<2x1x64xf32, #tpu.memory_space<vmem>>, vector<1x1x64xf32>
    %52 = vector.shape_cast %51 : vector<1x1x64xf32> to vector<1x64xf32>
    %c0_38 = arith.constant 0 : index
    %c0_39 = arith.constant 0 : index
    %c0_40 = arith.constant 0 : index
    %53 = vector.load %arg13[%c0_38, %c0_39, %c0_40] : memref<2x64x32xf32, #tpu.memory_space<vmem>>, vector<1x64x32xf32>
    %54 = vector.shape_cast %53 : vector<1x64x32xf32> to vector<64x32xf32>
    %c0_41 = arith.constant 0 : index
    %c0_42 = arith.constant 0 : index
    %c0_43 = arith.constant 0 : index
    %55 = vector.load %arg14[%c0_41, %c0_42, %c0_43] : memref<2x1x32xf32, #tpu.memory_space<vmem>>, vector<1x1x32xf32>
    %56 = vector.shape_cast %55 : vector<1x1x32xf32> to vector<1x32xf32>
    %c0_44 = arith.constant 0 : index
    %c0_45 = arith.constant 0 : index
    %c0_46 = arith.constant 0 : index
    %57 = vector.load %arg15[%c0_44, %c0_45, %c0_46] : memref<2x1x32xf32, #tpu.memory_space<vmem>>, vector<1x1x32xf32>
    %58 = vector.shape_cast %57 : vector<1x1x32xf32> to vector<1x32xf32>
    %c0_47 = arith.constant 0 : index
    %c0_48 = arith.constant 0 : index
    %c0_49 = arith.constant 0 : index
    %59 = vector.load %arg16[%c0_47, %c0_48, %c0_49] : memref<2x1x32xf32, #tpu.memory_space<vmem>>, vector<1x1x32xf32>
    %60 = vector.shape_cast %59 : vector<1x1x32xf32> to vector<1x32xf32>
    %cst_50 = arith.constant dense<0.000000e+00> : vector<8x96xf32>
    %61 = tpu.matmul %36, %38, %cst_50 {dimension_numbers = #tpu.dot_dimension_numbers<[1], [0], [0], [1], [0, 0, 1, 1], [], []>} : vector<8x32xf32>, vector<32x96xf32>, vector<8x96xf32> -> vector<8x96xf32>
    %62 = vector.broadcast %40 : vector<1x96xf32> to vector<8x96xf32>
    %63 = arith.addf %61, %62 : vector<8x96xf32>
    %64 = vector.extract_strided_slice %63 {offsets = [0, 0], sizes = [4, 96], strides = [1, 1]} : vector<8x96xf32> to vector<4x96xf32>
    %65 = vector.extract_strided_slice %63 {offsets = [4, 0], sizes = [4, 96], strides = [1, 1]} : vector<8x96xf32> to vector<4x96xf32>
    %66 = vector.shape_cast %64 : vector<4x96xf32> to vector<1x4x96xf32>
    %67 = vector.shape_cast %65 : vector<4x96xf32> to vector<1x4x96xf32>
    %68 = tpu.concatenate %66, %67 in 0 : vector<1x4x96xf32>, vector<1x4x96xf32> -> vector<2x4x96xf32>
    %69 = vector.extract_strided_slice %68 {offsets = [0, 0, 0], sizes = [2, 4, 16], strides = [1, 1, 1]} : vector<2x4x96xf32> to vector<2x4x16xf32>
    %70 = vector.extract_strided_slice %68 {offsets = [0, 0, 32], sizes = [2, 4, 16], strides = [1, 1, 1]} : vector<2x4x96xf32> to vector<2x4x16xf32>
    %71 = vector.extract_strided_slice %68 {offsets = [0, 0, 64], sizes = [2, 4, 16], strides = [1, 1, 1]} : vector<2x4x96xf32> to vector<2x4x16xf32>
    "tpu.trace_start"() <{level = 10 : i32, message = "bqd,bkd->bqk"}> : () -> ()
    %cst_51 = arith.constant dense<0.000000e+00> : vector<2x4x4xf32>
    %72 = tpu.matmul %69, %70, %cst_51 {dimension_numbers = #tpu.dot_dimension_numbers<[2], [2], [1], [1], [0, 0, 0, 1, 1, 1], [0], [0]>} : vector<2x4x16xf32>, vector<2x4x16xf32>, vector<2x4x4xf32> -> vector<2x4x4xf32>
    "tpu.trace_stop"() : () -> ()
    %cst_52 = arith.constant 2.500000e-01 : f32
    %73 = vector.broadcast %cst_52 : f32 to vector<2x4x4xf32>
    %74 = arith.mulf %72, %73 : vector<2x4x4xf32>
    %75 = vector.extract_strided_slice %68 {offsets = [0, 0, 16], sizes = [2, 4, 16], strides = [1, 1, 1]} : vector<2x4x96xf32> to vector<2x4x16xf32>
    %76 = vector.extract_strided_slice %68 {offsets = [0, 0, 48], sizes = [2, 4, 16], strides = [1, 1, 1]} : vector<2x4x96xf32> to vector<2x4x16xf32>
    %77 = vector.extract_strided_slice %68 {offsets = [0, 0, 80], sizes = [2, 4, 16], strides = [1, 1, 1]} : vector<2x4x96xf32> to vector<2x4x16xf32>
    "tpu.trace_start"() <{level = 10 : i32, message = "bqd,bkd->bqk"}> : () -> ()
    %cst_53 = arith.constant dense<0.000000e+00> : vector<2x4x4xf32>
    %78 = tpu.matmul %75, %76, %cst_53 {dimension_numbers = #tpu.dot_dimension_numbers<[2], [2], [1], [1], [0, 0, 0, 1, 1, 1], [0], [0]>} : vector<2x4x16xf32>, vector<2x4x16xf32>, vector<2x4x4xf32> -> vector<2x4x4xf32>
    "tpu.trace_stop"() : () -> ()
    %cst_54 = arith.constant 2.500000e-01 : f32
    %79 = vector.broadcast %cst_54 : f32 to vector<2x4x4xf32>
    %80 = arith.mulf %78, %79 : vector<2x4x4xf32>
    %81 = tpu.concatenate %74, %80 in 1 : vector<2x4x4xf32>, vector<2x4x4xf32> -> vector<2x8x4xf32>
    %cst_55 = arith.constant dense<0xFF800000> : vector<2x8xf32>
    %82 = vector.multi_reduction <maximumf>, %81, %cst_55 [2] : vector<2x8x4xf32> to vector<2x8xf32>
    %83 = vector.shape_cast %82 : vector<2x8xf32> to vector<2x8x1xf32>
    %84 = vector.broadcast %83 : vector<2x8x1xf32> to vector<2x8x4xf32>
    %85 = arith.subf %81, %84 : vector<2x8x4xf32>
    %86 = math.exp %85 : vector<2x8x4xf32>
    %cst_56 = arith.constant dense<0.000000e+00> : vector<2x8xf32>
    %87 = vector.multi_reduction <add>, %86, %cst_56 [2] : vector<2x8x4xf32> to vector<2x8xf32>
    %88 = vector.shape_cast %87 : vector<2x8xf32> to vector<2x8x1xf32>
    %89 = vector.broadcast %88 : vector<2x8x1xf32> to vector<2x8x4xf32>
    %90 = arith.divf %86, %89 : vector<2x8x4xf32>
    %91 = vector.extract_strided_slice %90 {offsets = [0, 0, 0], sizes = [2, 4, 4], strides = [1, 1, 1]} : vector<2x8x4xf32> to vector<2x4x4xf32>
    "tpu.trace_start"() <{level = 10 : i32, message = "bqk,bkd->bqd"}> : () -> ()
    %cst_57 = arith.constant dense<0.000000e+00> : vector<2x4x16xf32>
    %92 = tpu.matmul %91, %71, %cst_57 {dimension_numbers = #tpu.dot_dimension_numbers<[2], [1], [1], [2], [0, 0, 0, 1, 1, 2], [0], [0]>} : vector<2x4x4xf32>, vector<2x4x16xf32>, vector<2x4x16xf32> -> vector<2x4x16xf32>
    "tpu.trace_stop"() : () -> ()
    %93 = vector.extract_strided_slice %90 {offsets = [0, 4, 0], sizes = [2, 4, 4], strides = [1, 1, 1]} : vector<2x8x4xf32> to vector<2x4x4xf32>
    "tpu.trace_start"() <{level = 10 : i32, message = "bqk,bkd->bqd"}> : () -> ()
    %cst_58 = arith.constant dense<0.000000e+00> : vector<2x4x16xf32>
    %94 = tpu.matmul %93, %77, %cst_58 {dimension_numbers = #tpu.dot_dimension_numbers<[2], [1], [1], [2], [0, 0, 0, 1, 1, 2], [0], [0]>} : vector<2x4x4xf32>, vector<2x4x16xf32>, vector<2x4x16xf32> -> vector<2x4x16xf32>
    "tpu.trace_stop"() : () -> ()
    %95 = tpu.concatenate %92, %94 in 2 : vector<2x4x16xf32>, vector<2x4x16xf32> -> vector<2x4x32xf32>
    %96 = vector.extract_strided_slice %95 {offsets = [0, 0, 0], sizes = [1, 4, 32], strides = [1, 1, 1]} : vector<2x4x32xf32> to vector<1x4x32xf32>
    %97 = vector.shape_cast %96 : vector<1x4x32xf32> to vector<4x32xf32>
    %98 = vector.extract_strided_slice %95 {offsets = [1, 0, 0], sizes = [1, 4, 32], strides = [1, 1, 1]} : vector<2x4x32xf32> to vector<1x4x32xf32>
    %99 = vector.shape_cast %98 : vector<1x4x32xf32> to vector<4x32xf32>
    %100 = tpu.concatenate %97, %99 in 0 : vector<4x32xf32>, vector<4x32xf32> -> vector<8x32xf32>
    %cst_59 = arith.constant dense<0.000000e+00> : vector<8x32xf32>
    %101 = tpu.matmul %100, %42, %cst_59 {dimension_numbers = #tpu.dot_dimension_numbers<[1], [0], [0], [1], [0, 0, 1, 1], [], []>} : vector<8x32xf32>, vector<32x32xf32>, vector<8x32xf32> -> vector<8x32xf32>
    %102 = vector.broadcast %44 : vector<1x32xf32> to vector<8x32xf32>
    %103 = arith.addf %101, %102 : vector<8x32xf32>
    %104 = arith.addf %103, %36 : vector<8x32xf32>
    %cst_60 = arith.constant dense<0.000000e+00> : vector<8xf32>
    %105 = vector.multi_reduction <add>, %104, %cst_60 [1] : vector<8x32xf32> to vector<8xf32>
    %106 = vector.shape_cast %105 : vector<8xf32> to vector<8x1xf32>
    %cst_61 = arith.constant 3.200000e+01 : f32
    %107 = vector.broadcast %cst_61 : f32 to vector<8x1xf32>
    %108 = arith.divf %106, %107 : vector<8x1xf32>
    %109 = vector.broadcast %108 : vector<8x1xf32> to vector<8x32xf32>
    %110 = arith.subf %104, %109 : vector<8x32xf32>
    %111 = arith.mulf %110, %110 : vector<8x32xf32>
    %cst_62 = arith.constant dense<0.000000e+00> : vector<8xf32>
    %112 = vector.multi_reduction <add>, %111, %cst_62 [1] : vector<8x32xf32> to vector<8xf32>
    %113 = vector.shape_cast %112 : vector<8xf32> to vector<8x1xf32>
    %cst_63 = arith.constant 3.200000e+01 : f32
    %114 = vector.broadcast %cst_63 : f32 to vector<8x1xf32>
    %115 = arith.divf %113, %114 : vector<8x1xf32>
    %cst_64 = arith.constant 9.99999996E-13 : f32
    %116 = vector.broadcast %cst_64 : f32 to vector<8x1xf32>
    %117 = arith.addf %115, %116 : vector<8x1xf32>
    %118 = math.rsqrt %117 : vector<8x1xf32>
    %119 = vector.broadcast %118 : vector<8x1xf32> to vector<8x32xf32>
    %120 = arith.mulf %110, %119 : vector<8x32xf32>
    %121 = vector.broadcast %46 : vector<1x32xf32> to vector<8x32xf32>
    %122 = arith.mulf %120, %121 : vector<8x32xf32>
    %123 = vector.broadcast %48 : vector<1x32xf32> to vector<8x32xf32>
    %124 = arith.addf %122, %123 : vector<8x32xf32>
    %cst_65 = arith.constant dense<0.000000e+00> : vector<8x64xf32>
    %125 = tpu.matmul %124, %50, %cst_65 {dimension_numbers = #tpu.dot_dimension_numbers<[1], [0], [0], [1], [0, 0, 1, 1], [], []>} : vector<8x32xf32>, vector<32x64xf32>, vector<8x64xf32> -> vector<8x64xf32>
    %126 = vector.broadcast %52 : vector<1x64xf32> to vector<8x64xf32>
    %127 = arith.addf %125, %126 : vector<8x64xf32>
    %cst_66 = arith.constant 5.000000e-01 : f32
    %128 = vector.broadcast %cst_66 : f32 to vector<8x64xf32>
    %129 = arith.mulf %128, %127 : vector<8x64xf32>
    %cst_67 = arith.constant 0.707106769 : f32
    %130 = vector.broadcast %cst_67 : f32 to vector<8x64xf32>
    %131 = arith.mulf %127, %130 : vector<8x64xf32>
    %132 = math.erf %131 : vector<8x64xf32>
    %cst_68 = arith.constant 1.000000e+00 : f32
    %133 = vector.broadcast %cst_68 : f32 to vector<8x64xf32>
    %134 = arith.addf %133, %132 : vector<8x64xf32>
    %135 = arith.mulf %129, %134 : vector<8x64xf32>
    %cst_69 = arith.constant dense<0.000000e+00> : vector<8x32xf32>
    %136 = tpu.matmul %135, %54, %cst_69 {dimension_numbers = #tpu.dot_dimension_numbers<[1], [0], [0], [1], [0, 0, 1, 1], [], []>} : vector<8x64xf32>, vector<64x32xf32>, vector<8x32xf32> -> vector<8x32xf32>
    %137 = vector.broadcast %56 : vector<1x32xf32> to vector<8x32xf32>
    %138 = arith.addf %136, %137 : vector<8x32xf32>
    %139 = arith.addf %138, %124 : vector<8x32xf32>
    %cst_70 = arith.constant dense<0.000000e+00> : vector<8xf32>
    %140 = vector.multi_reduction <add>, %139, %cst_70 [1] : vector<8x32xf32> to vector<8xf32>
    %141 = vector.shape_cast %140 : vector<8xf32> to vector<8x1xf32>
    %cst_71 = arith.constant 3.200000e+01 : f32
    %142 = vector.broadcast %cst_71 : f32 to vector<8x1xf32>
    %143 = arith.divf %141, %142 : vector<8x1xf32>
    %144 = vector.broadcast %143 : vector<8x1xf32> to vector<8x32xf32>
    %145 = arith.subf %139, %144 : vector<8x32xf32>
    %146 = arith.mulf %145, %145 : vector<8x32xf32>
    %cst_72 = arith.constant dense<0.000000e+00> : vector<8xf32>
    %147 = vector.multi_reduction <add>, %146, %cst_72 [1] : vector<8x32xf32> to vector<8xf32>
    %148 = vector.shape_cast %147 : vector<8xf32> to vector<8x1xf32>
    %cst_73 = arith.constant 3.200000e+01 : f32
    %149 = vector.broadcast %cst_73 : f32 to vector<8x1xf32>
    %150 = arith.divf %148, %149 : vector<8x1xf32>
    %cst_74 = arith.constant 9.99999996E-13 : f32
    %151 = vector.broadcast %cst_74 : f32 to vector<8x1xf32>
    %152 = arith.addf %150, %151 : vector<8x1xf32>
    %153 = math.rsqrt %152 : vector<8x1xf32>
    %154 = vector.broadcast %153 : vector<8x1xf32> to vector<8x32xf32>
    %155 = arith.mulf %145, %154 : vector<8x32xf32>
    %156 = vector.broadcast %58 : vector<1x32xf32> to vector<8x32xf32>
    %157 = arith.mulf %155, %156 : vector<8x32xf32>
    %158 = vector.broadcast %60 : vector<1x32xf32> to vector<8x32xf32>
    %159 = arith.addf %157, %158 : vector<8x32xf32>
    %c1 = arith.constant 1 : index
    %c0_75 = arith.constant 0 : index
    %c0_76 = arith.constant 0 : index
    %160 = vector.load %arg5[%c1, %c0_75, %c0_76] : memref<2x32x96xf32, #tpu.memory_space<vmem>>, vector<1x32x96xf32>
    %161 = vector.shape_cast %160 : vector<1x32x96xf32> to vector<32x96xf32>
    %c1_77 = arith.constant 1 : index
    %c0_78 = arith.constant 0 : index
    %c0_79 = arith.constant 0 : index
    %162 = vector.load %arg6[%c1_77, %c0_78, %c0_79] : memref<2x1x96xf32, #tpu.memory_space<vmem>>, vector<1x1x96xf32>
    %163 = vector.shape_cast %162 : vector<1x1x96xf32> to vector<1x96xf32>
    %c1_80 = arith.constant 1 : index
    %c0_81 = arith.constant 0 : index
    %c0_82 = arith.constant 0 : index
    %164 = vector.load %arg7[%c1_80, %c0_81, %c0_82] : memref<2x32x32xf32, #tpu.memory_space<vmem>>, vector<1x32x32xf32>
    %165 = vector.shape_cast %164 : vector<1x32x32xf32> to vector<32x32xf32>
    %c1_83 = arith.constant 1 : index
    %c0_84 = arith.constant 0 : index
    %c0_85 = arith.constant 0 : index
    %166 = vector.load %arg8[%c1_83, %c0_84, %c0_85] : memref<2x1x32xf32, #tpu.memory_space<vmem>>, vector<1x1x32xf32>
    %167 = vector.shape_cast %166 : vector<1x1x32xf32> to vector<1x32xf32>
    %c1_86 = arith.constant 1 : index
    %c0_87 = arith.constant 0 : index
    %c0_88 = arith.constant 0 : index
    %168 = vector.load %arg9[%c1_86, %c0_87, %c0_88] : memref<2x1x32xf32, #tpu.memory_space<vmem>>, vector<1x1x32xf32>
    %169 = vector.shape_cast %168 : vector<1x1x32xf32> to vector<1x32xf32>
    %c1_89 = arith.constant 1 : index
    %c0_90 = arith.constant 0 : index
    %c0_91 = arith.constant 0 : index
    %170 = vector.load %arg10[%c1_89, %c0_90, %c0_91] : memref<2x1x32xf32, #tpu.memory_space<vmem>>, vector<1x1x32xf32>
    %171 = vector.shape_cast %170 : vector<1x1x32xf32> to vector<1x32xf32>
    %c1_92 = arith.constant 1 : index
    %c0_93 = arith.constant 0 : index
    %c0_94 = arith.constant 0 : index
    %172 = vector.load %arg11[%c1_92, %c0_93, %c0_94] : memref<2x32x64xf32, #tpu.memory_space<vmem>>, vector<1x32x64xf32>
    %173 = vector.shape_cast %172 : vector<1x32x64xf32> to vector<32x64xf32>
    %c1_95 = arith.constant 1 : index
    %c0_96 = arith.constant 0 : index
    %c0_97 = arith.constant 0 : index
    %174 = vector.load %arg12[%c1_95, %c0_96, %c0_97] : memref<2x1x64xf32, #tpu.memory_space<vmem>>, vector<1x1x64xf32>
    %175 = vector.shape_cast %174 : vector<1x1x64xf32> to vector<1x64xf32>
    %c1_98 = arith.constant 1 : index
    %c0_99 = arith.constant 0 : index
    %c0_100 = arith.constant 0 : index
    %176 = vector.load %arg13[%c1_98, %c0_99, %c0_100] : memref<2x64x32xf32, #tpu.memory_space<vmem>>, vector<1x64x32xf32>
    %177 = vector.shape_cast %176 : vector<1x64x32xf32> to vector<64x32xf32>
    %c1_101 = arith.constant 1 : index
    %c0_102 = arith.constant 0 : index
    %c0_103 = arith.constant 0 : index
    %178 = vector.load %arg14[%c1_101, %c0_102, %c0_103] : memref<2x1x32xf32, #tpu.memory_space<vmem>>, vector<1x1x32xf32>
    %179 = vector.shape_cast %178 : vector<1x1x32xf32> to vector<1x32xf32>
    %c1_104 = arith.constant 1 : index
    %c0_105 = arith.constant 0 : index
    %c0_106 = arith.constant 0 : index
    %180 = vector.load %arg15[%c1_104, %c0_105, %c0_106] : memref<2x1x32xf32, #tpu.memory_space<vmem>>, vector<1x1x32xf32>
    %181 = vector.shape_cast %180 : vector<1x1x32xf32> to vector<1x32xf32>
    %c1_107 = arith.constant 1 : index
    %c0_108 = arith.constant 0 : index
    %c0_109 = arith.constant 0 : index
    %182 = vector.load %arg16[%c1_107, %c0_108, %c0_109] : memref<2x1x32xf32, #tpu.memory_space<vmem>>, vector<1x1x32xf32>
    %183 = vector.shape_cast %182 : vector<1x1x32xf32> to vector<1x32xf32>
    %cst_110 = arith.constant dense<0.000000e+00> : vector<8x96xf32>
    %184 = tpu.matmul %159, %161, %cst_110 {dimension_numbers = #tpu.dot_dimension_numbers<[1], [0], [0], [1], [0, 0, 1, 1], [], []>} : vector<8x32xf32>, vector<32x96xf32>, vector<8x96xf32> -> vector<8x96xf32>
    %185 = vector.broadcast %163 : vector<1x96xf32> to vector<8x96xf32>
    %186 = arith.addf %184, %185 : vector<8x96xf32>
    %187 = vector.extract_strided_slice %186 {offsets = [0, 0], sizes = [4, 96], strides = [1, 1]} : vector<8x96xf32> to vector<4x96xf32>
    %188 = vector.extract_strided_slice %186 {offsets = [4, 0], sizes = [4, 96], strides = [1, 1]} : vector<8x96xf32> to vector<4x96xf32>
    %189 = vector.shape_cast %187 : vector<4x96xf32> to vector<1x4x96xf32>
    %190 = vector.shape_cast %188 : vector<4x96xf32> to vector<1x4x96xf32>
    %191 = tpu.concatenate %189, %190 in 0 : vector<1x4x96xf32>, vector<1x4x96xf32> -> vector<2x4x96xf32>
    %192 = vector.extract_strided_slice %191 {offsets = [0, 0, 0], sizes = [2, 4, 16], strides = [1, 1, 1]} : vector<2x4x96xf32> to vector<2x4x16xf32>
    %193 = vector.extract_strided_slice %191 {offsets = [0, 0, 32], sizes = [2, 4, 16], strides = [1, 1, 1]} : vector<2x4x96xf32> to vector<2x4x16xf32>
    %194 = vector.extract_strided_slice %191 {offsets = [0, 0, 64], sizes = [2, 4, 16], strides = [1, 1, 1]} : vector<2x4x96xf32> to vector<2x4x16xf32>
    "tpu.trace_start"() <{level = 10 : i32, message = "bqd,bkd->bqk"}> : () -> ()
    %cst_111 = arith.constant dense<0.000000e+00> : vector<2x4x4xf32>
    %195 = tpu.matmul %192, %193, %cst_111 {dimension_numbers = #tpu.dot_dimension_numbers<[2], [2], [1], [1], [0, 0, 0, 1, 1, 1], [0], [0]>} : vector<2x4x16xf32>, vector<2x4x16xf32>, vector<2x4x4xf32> -> vector<2x4x4xf32>
    "tpu.trace_stop"() : () -> ()
    %cst_112 = arith.constant 2.500000e-01 : f32
    %196 = vector.broadcast %cst_112 : f32 to vector<2x4x4xf32>
    %197 = arith.mulf %195, %196 : vector<2x4x4xf32>
    %198 = vector.extract_strided_slice %191 {offsets = [0, 0, 16], sizes = [2, 4, 16], strides = [1, 1, 1]} : vector<2x4x96xf32> to vector<2x4x16xf32>
    %199 = vector.extract_strided_slice %191 {offsets = [0, 0, 48], sizes = [2, 4, 16], strides = [1, 1, 1]} : vector<2x4x96xf32> to vector<2x4x16xf32>
    %200 = vector.extract_strided_slice %191 {offsets = [0, 0, 80], sizes = [2, 4, 16], strides = [1, 1, 1]} : vector<2x4x96xf32> to vector<2x4x16xf32>
    "tpu.trace_start"() <{level = 10 : i32, message = "bqd,bkd->bqk"}> : () -> ()
    %cst_113 = arith.constant dense<0.000000e+00> : vector<2x4x4xf32>
    %201 = tpu.matmul %198, %199, %cst_113 {dimension_numbers = #tpu.dot_dimension_numbers<[2], [2], [1], [1], [0, 0, 0, 1, 1, 1], [0], [0]>} : vector<2x4x16xf32>, vector<2x4x16xf32>, vector<2x4x4xf32> -> vector<2x4x4xf32>
    "tpu.trace_stop"() : () -> ()
    %cst_114 = arith.constant 2.500000e-01 : f32
    %202 = vector.broadcast %cst_114 : f32 to vector<2x4x4xf32>
    %203 = arith.mulf %201, %202 : vector<2x4x4xf32>
    %204 = tpu.concatenate %197, %203 in 1 : vector<2x4x4xf32>, vector<2x4x4xf32> -> vector<2x8x4xf32>
    %cst_115 = arith.constant dense<0xFF800000> : vector<2x8xf32>
    %205 = vector.multi_reduction <maximumf>, %204, %cst_115 [2] : vector<2x8x4xf32> to vector<2x8xf32>
    %206 = vector.shape_cast %205 : vector<2x8xf32> to vector<2x8x1xf32>
    %207 = vector.broadcast %206 : vector<2x8x1xf32> to vector<2x8x4xf32>
    %208 = arith.subf %204, %207 : vector<2x8x4xf32>
    %209 = math.exp %208 : vector<2x8x4xf32>
    %cst_116 = arith.constant dense<0.000000e+00> : vector<2x8xf32>
    %210 = vector.multi_reduction <add>, %209, %cst_116 [2] : vector<2x8x4xf32> to vector<2x8xf32>
    %211 = vector.shape_cast %210 : vector<2x8xf32> to vector<2x8x1xf32>
    %212 = vector.broadcast %211 : vector<2x8x1xf32> to vector<2x8x4xf32>
    %213 = arith.divf %209, %212 : vector<2x8x4xf32>
    %214 = vector.extract_strided_slice %213 {offsets = [0, 0, 0], sizes = [2, 4, 4], strides = [1, 1, 1]} : vector<2x8x4xf32> to vector<2x4x4xf32>
    "tpu.trace_start"() <{level = 10 : i32, message = "bqk,bkd->bqd"}> : () -> ()
    %cst_117 = arith.constant dense<0.000000e+00> : vector<2x4x16xf32>
    %215 = tpu.matmul %214, %194, %cst_117 {dimension_numbers = #tpu.dot_dimension_numbers<[2], [1], [1], [2], [0, 0, 0, 1, 1, 2], [0], [0]>} : vector<2x4x4xf32>, vector<2x4x16xf32>, vector<2x4x16xf32> -> vector<2x4x16xf32>
    "tpu.trace_stop"() : () -> ()
    %216 = vector.extract_strided_slice %213 {offsets = [0, 4, 0], sizes = [2, 4, 4], strides = [1, 1, 1]} : vector<2x8x4xf32> to vector<2x4x4xf32>
    "tpu.trace_start"() <{level = 10 : i32, message = "bqk,bkd->bqd"}> : () -> ()
    %cst_118 = arith.constant dense<0.000000e+00> : vector<2x4x16xf32>
    %217 = tpu.matmul %216, %200, %cst_118 {dimension_numbers = #tpu.dot_dimension_numbers<[2], [1], [1], [2], [0, 0, 0, 1, 1, 2], [0], [0]>} : vector<2x4x4xf32>, vector<2x4x16xf32>, vector<2x4x16xf32> -> vector<2x4x16xf32>
    "tpu.trace_stop"() : () -> ()
    %218 = tpu.concatenate %215, %217 in 2 : vector<2x4x16xf32>, vector<2x4x16xf32> -> vector<2x4x32xf32>
    %219 = vector.extract_strided_slice %218 {offsets = [0, 0, 0], sizes = [1, 4, 32], strides = [1, 1, 1]} : vector<2x4x32xf32> to vector<1x4x32xf32>
    %220 = vector.shape_cast %219 : vector<1x4x32xf32> to vector<4x32xf32>
    %221 = vector.extract_strided_slice %218 {offsets = [1, 0, 0], sizes = [1, 4, 32], strides = [1, 1, 1]} : vector<2x4x32xf32> to vector<1x4x32xf32>
    %222 = vector.shape_cast %221 : vector<1x4x32xf32> to vector<4x32xf32>
    %223 = tpu.concatenate %220, %222 in 0 : vector<4x32xf32>, vector<4x32xf32> -> vector<8x32xf32>
    %cst_119 = arith.constant dense<0.000000e+00> : vector<8x32xf32>
    %224 = tpu.matmul %223, %165, %cst_119 {dimension_numbers = #tpu.dot_dimension_numbers<[1], [0], [0], [1], [0, 0, 1, 1], [], []>} : vector<8x32xf32>, vector<32x32xf32>, vector<8x32xf32> -> vector<8x32xf32>
    %225 = vector.broadcast %167 : vector<1x32xf32> to vector<8x32xf32>
    %226 = arith.addf %224, %225 : vector<8x32xf32>
    %227 = arith.addf %226, %159 : vector<8x32xf32>
    %cst_120 = arith.constant dense<0.000000e+00> : vector<8xf32>
    %228 = vector.multi_reduction <add>, %227, %cst_120 [1] : vector<8x32xf32> to vector<8xf32>
    %229 = vector.shape_cast %228 : vector<8xf32> to vector<8x1xf32>
    %cst_121 = arith.constant 3.200000e+01 : f32
    %230 = vector.broadcast %cst_121 : f32 to vector<8x1xf32>
    %231 = arith.divf %229, %230 : vector<8x1xf32>
    %232 = vector.broadcast %231 : vector<8x1xf32> to vector<8x32xf32>
    %233 = arith.subf %227, %232 : vector<8x32xf32>
    %234 = arith.mulf %233, %233 : vector<8x32xf32>
    %cst_122 = arith.constant dense<0.000000e+00> : vector<8xf32>
    %235 = vector.multi_reduction <add>, %234, %cst_122 [1] : vector<8x32xf32> to vector<8xf32>
    %236 = vector.shape_cast %235 : vector<8xf32> to vector<8x1xf32>
    %cst_123 = arith.constant 3.200000e+01 : f32
    %237 = vector.broadcast %cst_123 : f32 to vector<8x1xf32>
    %238 = arith.divf %236, %237 : vector<8x1xf32>
    %cst_124 = arith.constant 9.99999996E-13 : f32
    %239 = vector.broadcast %cst_124 : f32 to vector<8x1xf32>
    %240 = arith.addf %238, %239 : vector<8x1xf32>
    %241 = math.rsqrt %240 : vector<8x1xf32>
    %242 = vector.broadcast %241 : vector<8x1xf32> to vector<8x32xf32>
    %243 = arith.mulf %233, %242 : vector<8x32xf32>
    %244 = vector.broadcast %169 : vector<1x32xf32> to vector<8x32xf32>
    %245 = arith.mulf %243, %244 : vector<8x32xf32>
    %246 = vector.broadcast %171 : vector<1x32xf32> to vector<8x32xf32>
    %247 = arith.addf %245, %246 : vector<8x32xf32>
    %cst_125 = arith.constant dense<0.000000e+00> : vector<8x64xf32>
    %248 = tpu.matmul %247, %173, %cst_125 {dimension_numbers = #tpu.dot_dimension_numbers<[1], [0], [0], [1], [0, 0, 1, 1], [], []>} : vector<8x32xf32>, vector<32x64xf32>, vector<8x64xf32> -> vector<8x64xf32>
    %249 = vector.broadcast %175 : vector<1x64xf32> to vector<8x64xf32>
    %250 = arith.addf %248, %249 : vector<8x64xf32>
    %cst_126 = arith.constant 5.000000e-01 : f32
    %251 = vector.broadcast %cst_126 : f32 to vector<8x64xf32>
    %252 = arith.mulf %251, %250 : vector<8x64xf32>
    %cst_127 = arith.constant 0.707106769 : f32
    %253 = vector.broadcast %cst_127 : f32 to vector<8x64xf32>
    %254 = arith.mulf %250, %253 : vector<8x64xf32>
    %255 = math.erf %254 : vector<8x64xf32>
    %cst_128 = arith.constant 1.000000e+00 : f32
    %256 = vector.broadcast %cst_128 : f32 to vector<8x64xf32>
    %257 = arith.addf %256, %255 : vector<8x64xf32>
    %258 = arith.mulf %252, %257 : vector<8x64xf32>
    %cst_129 = arith.constant dense<0.000000e+00> : vector<8x32xf32>
    %259 = tpu.matmul %258, %177, %cst_129 {dimension_numbers = #tpu.dot_dimension_numbers<[1], [0], [0], [1], [0, 0, 1, 1], [], []>} : vector<8x64xf32>, vector<64x32xf32>, vector<8x32xf32> -> vector<8x32xf32>
    %260 = vector.broadcast %179 : vector<1x32xf32> to vector<8x32xf32>
    %261 = arith.addf %259, %260 : vector<8x32xf32>
    %262 = arith.addf %261, %247 : vector<8x32xf32>
    %cst_130 = arith.constant dense<0.000000e+00> : vector<8xf32>
    %263 = vector.multi_reduction <add>, %262, %cst_130 [1] : vector<8x32xf32> to vector<8xf32>
    %264 = vector.shape_cast %263 : vector<8xf32> to vector<8x1xf32>
    %cst_131 = arith.constant 3.200000e+01 : f32
    %265 = vector.broadcast %cst_131 : f32 to vector<8x1xf32>
    %266 = arith.divf %264, %265 : vector<8x1xf32>
    %267 = vector.broadcast %266 : vector<8x1xf32> to vector<8x32xf32>
    %268 = arith.subf %262, %267 : vector<8x32xf32>
    %269 = arith.mulf %268, %268 : vector<8x32xf32>
    %cst_132 = arith.constant dense<0.000000e+00> : vector<8xf32>
    %270 = vector.multi_reduction <add>, %269, %cst_132 [1] : vector<8x32xf32> to vector<8xf32>
    %271 = vector.shape_cast %270 : vector<8xf32> to vector<8x1xf32>
    %cst_133 = arith.constant 3.200000e+01 : f32
    %272 = vector.broadcast %cst_133 : f32 to vector<8x1xf32>
    %273 = arith.divf %271, %272 : vector<8x1xf32>
    %cst_134 = arith.constant 9.99999996E-13 : f32
    %274 = vector.broadcast %cst_134 : f32 to vector<8x1xf32>
    %275 = arith.addf %273, %274 : vector<8x1xf32>
    %276 = math.rsqrt %275 : vector<8x1xf32>
    %277 = vector.broadcast %276 : vector<8x1xf32> to vector<8x32xf32>
    %278 = arith.mulf %268, %277 : vector<8x32xf32>
    %279 = vector.broadcast %181 : vector<1x32xf32> to vector<8x32xf32>
    %280 = arith.mulf %278, %279 : vector<8x32xf32>
    %281 = vector.broadcast %183 : vector<1x32xf32> to vector<8x32xf32>
    %282 = arith.addf %280, %281 : vector<8x32xf32>
    %c0_135 = arith.constant 0 : index
    %c0_136 = arith.constant 0 : index
    %283 = vector.load %arg17[%c0_135, %c0_136] : memref<32x64xf32, #tpu.memory_space<vmem>>, vector<32x64xf32>
    %cst_137 = arith.constant dense<0.000000e+00> : vector<8x64xf32>
    %284 = tpu.matmul %282, %283, %cst_137 {dimension_numbers = #tpu.dot_dimension_numbers<[1], [0], [0], [1], [0, 0, 1, 1], [], []>} : vector<8x32xf32>, vector<32x64xf32>, vector<8x64xf32> -> vector<8x64xf32>
    %c0_138 = arith.constant 0 : index
    %c0_139 = arith.constant 0 : index
    %285 = vector.load %arg19[%c0_138, %c0_139] : memref<1x64xf32, #tpu.memory_space<vmem>>, vector<1x64xf32>
    %286 = vector.broadcast %285 : vector<1x64xf32> to vector<8x64xf32>
    %287 = arith.addf %284, %286 : vector<8x64xf32>
    %288 = vector.extract_strided_slice %287 {offsets = [0, 0], sizes = [1, 64], strides = [1, 1]} : vector<8x64xf32> to vector<1x64xf32>
    %289 = vector.extract_strided_slice %287 {offsets = [4, 0], sizes = [1, 64], strides = [1, 1]} : vector<8x64xf32> to vector<1x64xf32>
    %290 = tpu.concatenate %288, %289 in 0 : vector<1x64xf32>, vector<1x64xf32> -> vector<2x64xf32>
    %291 = vector.extract_strided_slice %287 {offsets = [1, 0], sizes = [1, 64], strides = [1, 1]} : vector<8x64xf32> to vector<1x64xf32>
    %292 = vector.extract_strided_slice %287 {offsets = [5, 0], sizes = [1, 64], strides = [1, 1]} : vector<8x64xf32> to vector<1x64xf32>
    %293 = tpu.concatenate %291, %292 in 0 : vector<1x64xf32>, vector<1x64xf32> -> vector<2x64xf32>
    %294 = vector.extract_strided_slice %287 {offsets = [2, 0], sizes = [1, 64], strides = [1, 1]} : vector<8x64xf32> to vector<1x64xf32>
    %295 = vector.extract_strided_slice %287 {offsets = [6, 0], sizes = [1, 64], strides = [1, 1]} : vector<8x64xf32> to vector<1x64xf32>
    %296 = tpu.concatenate %294, %295 in 0 : vector<1x64xf32>, vector<1x64xf32> -> vector<2x64xf32>
    %297 = vector.extract_strided_slice %287 {offsets = [3, 0], sizes = [1, 64], strides = [1, 1]} : vector<8x64xf32> to vector<1x64xf32>
    %298 = vector.extract_strided_slice %287 {offsets = [7, 0], sizes = [1, 64], strides = [1, 1]} : vector<8x64xf32> to vector<1x64xf32>
    %299 = tpu.concatenate %297, %298 in 0 : vector<1x64xf32>, vector<1x64xf32> -> vector<2x64xf32>
    %c0_140 = arith.constant 0 : index
    %c0_141 = arith.constant 0 : index
    %300 = vector.load %arg18[%c0_140, %c0_141] : memref<16x64xf32, #tpu.memory_space<vmem>>, vector<16x64xf32>
    %c0_142 = arith.constant 0 : index
    %c0_143 = arith.constant 0 : index
    %301 = vector.load %arg20[%c0_142, %c0_143] : memref<64x64xf32, #tpu.memory_space<vmem>>, vector<64x64xf32>
    %cst_144 = arith.constant 0.000000e+00 : f32
    %302 = vector.broadcast %cst_144 : f32 to vector<2x16xf32>
    %cst_145 = arith.constant 0.000000e+00 : f32
    %303 = vector.broadcast %cst_145 : f32 to vector<2x16xf32>
    %cst_146 = arith.constant 0.000000e+00 : f32
    %304 = vector.broadcast %cst_146 : f32 to vector<2x64xf32>
    %cst_147 = arith.constant dense<0.000000e+00> : vector<2x64xf32>
    %305 = tpu.matmul %302, %300, %cst_147 {dimension_numbers = #tpu.dot_dimension_numbers<[1], [0], [0], [1], [0, 0, 1, 1], [], []>} : vector<2x16xf32>, vector<16x64xf32>, vector<2x64xf32> -> vector<2x64xf32>
    %306 = arith.addf %290, %305 : vector<2x64xf32>
    %307 = vector.extract_strided_slice %306 {offsets = [0, 0], sizes = [2, 48], strides = [1, 1]} : vector<2x64xf32> to vector<2x48xf32>
    %308 = arith.negf %307 : vector<2x48xf32>
    %309 = math.exp %308 : vector<2x48xf32>
    %cst_148 = arith.constant 1.000000e+00 : f32
    %310 = vector.broadcast %cst_148 : f32 to vector<2x48xf32>
    %311 = arith.addf %310, %309 : vector<2x48xf32>
    %312 = arith.divf %310, %311 : vector<2x48xf32>
    %313 = vector.extract_strided_slice %306 {offsets = [0, 48], sizes = [2, 16], strides = [1, 1]} : vector<2x64xf32> to vector<2x16xf32>
    %314 = math.tanh %313 : vector<2x16xf32>
    %315 = vector.extract_strided_slice %312 {offsets = [0, 16], sizes = [2, 16], strides = [1, 1]} : vector<2x48xf32> to vector<2x16xf32>
    %316 = arith.mulf %315, %303 : vector<2x16xf32>
    %317 = vector.extract_strided_slice %312 {offsets = [0, 0], sizes = [2, 16], strides = [1, 1]} : vector<2x48xf32> to vector<2x16xf32>
    %318 = arith.mulf %317, %314 : vector<2x16xf32>
    %319 = arith.addf %316, %318 : vector<2x16xf32>
    %320 = vector.extract_strided_slice %312 {offsets = [0, 32], sizes = [2, 16], strides = [1, 1]} : vector<2x48xf32> to vector<2x16xf32>
    %321 = math.tanh %319 : vector<2x16xf32>
    %322 = arith.mulf %320, %321 : vector<2x16xf32>
    %323 = vector.extract_strided_slice %301 {offsets = [0, 0], sizes = [16, 64], strides = [1, 1]} : vector<64x64xf32> to vector<16x64xf32>
    %cst_149 = arith.constant dense<0.000000e+00> : vector<2x64xf32>
    %324 = tpu.matmul %322, %323, %cst_149 {dimension_numbers = #tpu.dot_dimension_numbers<[1], [0], [0], [1], [0, 0, 1, 1], [], []>} : vector<2x16xf32>, vector<16x64xf32>, vector<2x64xf32> -> vector<2x64xf32>
    %325 = arith.addf %304, %324 : vector<2x64xf32>
    %cst_150 = arith.constant dense<0.000000e+00> : vector<2x64xf32>
    %326 = tpu.matmul %322, %300, %cst_150 {dimension_numbers = #tpu.dot_dimension_numbers<[1], [0], [0], [1], [0, 0, 1, 1], [], []>} : vector<2x16xf32>, vector<16x64xf32>, vector<2x64xf32> -> vector<2x64xf32>
    %327 = arith.addf %293, %326 : vector<2x64xf32>
    %328 = vector.extract_strided_slice %327 {offsets = [0, 0], sizes = [2, 48], strides = [1, 1]} : vector<2x64xf32> to vector<2x48xf32>
    %329 = arith.negf %328 : vector<2x48xf32>
    %330 = math.exp %329 : vector<2x48xf32>
    %cst_151 = arith.constant 1.000000e+00 : f32
    %331 = vector.broadcast %cst_151 : f32 to vector<2x48xf32>
    %332 = arith.addf %331, %330 : vector<2x48xf32>
    %333 = arith.divf %331, %332 : vector<2x48xf32>
    %334 = vector.extract_strided_slice %327 {offsets = [0, 48], sizes = [2, 16], strides = [1, 1]} : vector<2x64xf32> to vector<2x16xf32>
    %335 = math.tanh %334 : vector<2x16xf32>
    %336 = vector.extract_strided_slice %333 {offsets = [0, 16], sizes = [2, 16], strides = [1, 1]} : vector<2x48xf32> to vector<2x16xf32>
    %337 = arith.mulf %336, %319 : vector<2x16xf32>
    %338 = vector.extract_strided_slice %333 {offsets = [0, 0], sizes = [2, 16], strides = [1, 1]} : vector<2x48xf32> to vector<2x16xf32>
    %339 = arith.mulf %338, %335 : vector<2x16xf32>
    %340 = arith.addf %337, %339 : vector<2x16xf32>
    %341 = vector.extract_strided_slice %333 {offsets = [0, 32], sizes = [2, 16], strides = [1, 1]} : vector<2x48xf32> to vector<2x16xf32>
    %342 = math.tanh %340 : vector<2x16xf32>
    %343 = arith.mulf %341, %342 : vector<2x16xf32>
    %344 = vector.extract_strided_slice %301 {offsets = [16, 0], sizes = [16, 64], strides = [1, 1]} : vector<64x64xf32> to vector<16x64xf32>
    %cst_152 = arith.constant dense<0.000000e+00> : vector<2x64xf32>
    %345 = tpu.matmul %343, %344, %cst_152 {dimension_numbers = #tpu.dot_dimension_numbers<[1], [0], [0], [1], [0, 0, 1, 1], [], []>} : vector<2x16xf32>, vector<16x64xf32>, vector<2x64xf32> -> vector<2x64xf32>
    %346 = arith.addf %325, %345 : vector<2x64xf32>
    %cst_153 = arith.constant dense<0.000000e+00> : vector<2x64xf32>
    %347 = tpu.matmul %343, %300, %cst_153 {dimension_numbers = #tpu.dot_dimension_numbers<[1], [0], [0], [1], [0, 0, 1, 1], [], []>} : vector<2x16xf32>, vector<16x64xf32>, vector<2x64xf32> -> vector<2x64xf32>
    %348 = arith.addf %296, %347 : vector<2x64xf32>
    %349 = vector.extract_strided_slice %348 {offsets = [0, 0], sizes = [2, 48], strides = [1, 1]} : vector<2x64xf32> to vector<2x48xf32>
    %350 = arith.negf %349 : vector<2x48xf32>
    %351 = math.exp %350 : vector<2x48xf32>
    %cst_154 = arith.constant 1.000000e+00 : f32
    %352 = vector.broadcast %cst_154 : f32 to vector<2x48xf32>
    %353 = arith.addf %352, %351 : vector<2x48xf32>
    %354 = arith.divf %352, %353 : vector<2x48xf32>
    %355 = vector.extract_strided_slice %348 {offsets = [0, 48], sizes = [2, 16], strides = [1, 1]} : vector<2x64xf32> to vector<2x16xf32>
    %356 = math.tanh %355 : vector<2x16xf32>
    %357 = vector.extract_strided_slice %354 {offsets = [0, 16], sizes = [2, 16], strides = [1, 1]} : vector<2x48xf32> to vector<2x16xf32>
    %358 = arith.mulf %357, %340 : vector<2x16xf32>
    %359 = vector.extract_strided_slice %354 {offsets = [0, 0], sizes = [2, 16], strides = [1, 1]} : vector<2x48xf32> to vector<2x16xf32>
    %360 = arith.mulf %359, %356 : vector<2x16xf32>
    %361 = arith.addf %358, %360 : vector<2x16xf32>
    %362 = vector.extract_strided_slice %354 {offsets = [0, 32], sizes = [2, 16], strides = [1, 1]} : vector<2x48xf32> to vector<2x16xf32>
    %363 = math.tanh %361 : vector<2x16xf32>
    %364 = arith.mulf %362, %363 : vector<2x16xf32>
    %365 = vector.extract_strided_slice %301 {offsets = [32, 0], sizes = [16, 64], strides = [1, 1]} : vector<64x64xf32> to vector<16x64xf32>
    %cst_155 = arith.constant dense<0.000000e+00> : vector<2x64xf32>
    %366 = tpu.matmul %364, %365, %cst_155 {dimension_numbers = #tpu.dot_dimension_numbers<[1], [0], [0], [1], [0, 0, 1, 1], [], []>} : vector<2x16xf32>, vector<16x64xf32>, vector<2x64xf32> -> vector<2x64xf32>
    %367 = arith.addf %346, %366 : vector<2x64xf32>
    %cst_156 = arith.constant dense<0.000000e+00> : vector<2x64xf32>
    %368 = tpu.matmul %364, %300, %cst_156 {dimension_numbers = #tpu.dot_dimension_numbers<[1], [0], [0], [1], [0, 0, 1, 1], [], []>} : vector<2x16xf32>, vector<16x64xf32>, vector<2x64xf32> -> vector<2x64xf32>
    %369 = arith.addf %299, %368 : vector<2x64xf32>
    %370 = vector.extract_strided_slice %369 {offsets = [0, 0], sizes = [2, 48], strides = [1, 1]} : vector<2x64xf32> to vector<2x48xf32>
    %371 = arith.negf %370 : vector<2x48xf32>
    %372 = math.exp %371 : vector<2x48xf32>
    %cst_157 = arith.constant 1.000000e+00 : f32
    %373 = vector.broadcast %cst_157 : f32 to vector<2x48xf32>
    %374 = arith.addf %373, %372 : vector<2x48xf32>
    %375 = arith.divf %373, %374 : vector<2x48xf32>
    %376 = vector.extract_strided_slice %369 {offsets = [0, 48], sizes = [2, 16], strides = [1, 1]} : vector<2x64xf32> to vector<2x16xf32>
    %377 = math.tanh %376 : vector<2x16xf32>
    %378 = vector.extract_strided_slice %375 {offsets = [0, 16], sizes = [2, 16], strides = [1, 1]} : vector<2x48xf32> to vector<2x16xf32>
    %379 = arith.mulf %378, %361 : vector<2x16xf32>
    %380 = vector.extract_strided_slice %375 {offsets = [0, 0], sizes = [2, 16], strides = [1, 1]} : vector<2x48xf32> to vector<2x16xf32>
    %381 = arith.mulf %380, %377 : vector<2x16xf32>
    %382 = arith.addf %379, %381 : vector<2x16xf32>
    %383 = vector.extract_strided_slice %375 {offsets = [0, 32], sizes = [2, 16], strides = [1, 1]} : vector<2x48xf32> to vector<2x16xf32>
    %384 = math.tanh %382 : vector<2x16xf32>
    %385 = arith.mulf %383, %384 : vector<2x16xf32>
    %386 = vector.extract_strided_slice %301 {offsets = [48, 0], sizes = [16, 64], strides = [1, 1]} : vector<64x64xf32> to vector<16x64xf32>
    %cst_158 = arith.constant dense<0.000000e+00> : vector<2x64xf32>
    %387 = tpu.matmul %385, %386, %cst_158 {dimension_numbers = #tpu.dot_dimension_numbers<[1], [0], [0], [1], [0, 0, 1, 1], [], []>} : vector<2x16xf32>, vector<16x64xf32>, vector<2x64xf32> -> vector<2x64xf32>
    %388 = arith.addf %367, %387 : vector<2x64xf32>
    %c0_159 = arith.constant 0 : index
    %c0_160 = arith.constant 0 : index
    %389 = vector.load %arg21[%c0_159, %c0_160] : memref<1x64xf32, #tpu.memory_space<vmem>>, vector<1x64xf32>
    %390 = vector.broadcast %389 : vector<1x64xf32> to vector<2x64xf32>
    %391 = arith.addf %388, %390 : vector<2x64xf32>
    %c0_161 = arith.constant 0 : index
    %c0_162 = arith.constant 0 : index
    %392 = vector.load %arg22[%c0_161, %c0_162] : memref<2x64xf32, #tpu.memory_space<vmem>>, vector<2x64xf32>
    tpu.vector_store %arg22[%c0_161, %c0_162], %391 {strides = array<i32>} : memref<2x64xf32, #tpu.memory_space<vmem>>, vector<2x64xf32>,
    return
  }
}

</mosaic_0001>

<bundles_post_ra>
// kernel: bert_autoencoder_forward.1
= control target key start
LH: loop header
LB: loop body
LE: loop exit
PB: predicated region body
PF: predicated region fallthrough
CT: control target
= control target key end

     0   :  { %s2838_s0 = inlined_call_operand.vmem [shape: f32[2,64], index: 0, kind: input, shape index: {}]   ;;  %s2839_s1 = inlined_call_operand.vmem [shape: f32[64,128], index: 1, kind: input, shape index: {}]   ;;  %s2840_s2 = inlined_call_operand.hbm [shape: f32[1,128], index: 2, kind: input, shape index: {}]   ;;  %s2841_s3 = inlined_call_operand.hbm [shape: f32[1,32], index: 3, kind: input, shape index: {}]   ;;  %s2842_s4 = inlined_call_operand.hbm [shape: f32[1,32], index: 4, kind: input, shape index: {}]   ;;  %s2843_s5 = inlined_call_operand.vmem [shape: f32[2,32,96], index: 5, kind: input, shape index: {}]   ;;  %s2844_s6 = inlined_call_operand.hbm [shape: f32[2,1,96], index: 6, kind: input, shape index: {}]   ;;  %s2845_s7 = inlined_call_operand.vmem [shape: f32[2,32,32], index: 7, kind: input, shape index: {}]   ;;  %s2846_s8 = inlined_call_operand.vmem [shape: f32[2,1,32], index: 8, kind: input, shape index: {}]   ;;  %s2847_s9 = inlined_call_operand.hbm [shape: f32[2,1,32], index: 9, kind: input, shape index: {}]   ;;  %s2848_s10 = inlined_call_operand.vmem [shape: f32[2,1,32], index: 10, kind: input, shape index: {}]   ;;  %s2849_s11 = inlined_call_operand.hbm [shape: f32[2,32,64], index: 11, kind: input, shape index: {}]   ;;  %s2850_s12 = inlined_call_operand.vmem [shape: f32[2,1,64], index: 12, kind: input, shape index: {}]   ;;  %s2851_s13 = inlined_call_operand.vmem [shape: f32[2,64,32], index: 13, kind: input, shape index: {}]   ;;  %s2852_s14 = inlined_call_operand.vmem [shape: f32[2,1,32], index: 14, kind: input, shape index: {}]   ;;  %s2853_s15 = inlined_call_operand.hbm [shape: f32[2,1,32], index: 15, kind: input, shape index: {}]   ;;  %s2854_s16 = inlined_call_operand.vmem [shape: f32[2,1,32], index: 16, kind: input, shape index: {}]   ;;  %s2855_s17 = inlined_call_operand.hbm [shape: f32[32,64], index: 17, kind: input, shape index: {}]   ;;  %s2856_s18 = inlined_call_operand.hbm [shape: f32[16,64], index: 18, kind: input, shape index: {}]   ;;  %s2857_s19 = inlined_call_operand.vmem [shape: f32[1,64], index: 19, kind: input, shape index: {}]   ;;  %s2858_s20 = inlined_call_operand.hbm [shape: f32[64,64], index: 20, kind: input, shape index: {}]   ;;  %s2859_s21 = inlined_call_operand.vmem [shape: f32[1,64], index: 21, kind: input, shape index: {}]   ;;  %s2860_s22 = inlined_call_operand.hbm [shape: f32[2,64], index: 22, kind: output, shape index: {}]  }
   0x1   :  { %2867 = sst [smem:[#allocation27_spill]] %s2838_s0 }
   0x2   :  { %2868 = sst [smem:[#allocation28_spill]] %s2839_s1 }
   0x3   :  { %2869 = sst [smem:[#allocation29_spill]] %s2840_s2 }
   0x4   :  { %2870 = sst [smem:[#allocation30_spill]] %s2841_s3 }
   0x5   :  { %2871 = sst [smem:[#allocation31_spill]] %s2842_s4 }
   0x6   :  { %2872 = sst [smem:[#allocation32_spill]] %s2843_s5 }
   0x7   :  { %2873 = sst [smem:[#allocation33_spill]] %s2844_s6 }
   0x8   :  { %27 = vsyncpa [#allocation3], 0 }
   0x9   :  { %28 = vsyncpa [#allocation6], 0 }
   0xa   :  { %29 = vsyncpa [#allocation9], 0 }
   0xb   :  { %30 = vsyncpa [#allocation12], 0 }
   0xc   :  { %31 = vsyncpa [#allocation15], 0 }
   0xd   :  { %32 = vsyncpa [#allocation18], 0  ;;  %s2874_s29 = sld [smem:[#allocation30_spill]] }
  0x13   :  { %s54_s30 = sshll.u32 %s2874_s29, 4  ;;  %s55_s30 = int_to_ptr.hbm [resolvable:$true] %s54_s30 }
  0x14   :  { %33 = vsyncpa [#allocation4], 0  ;;  %s2299_s4 = smov [#allocation5]   ;;  %s2875_s5 = sld [smem:[#allocation33_spill]] }
  0x15   :  { %s56_s0 = sshll.u32 %s2299_s4, 4  ;;  %s2300_s6 = smov [#allocation8]   ;;  %s57_s0 = int_to_ptr.vmem [resolvable:$true] %s56_s0 }
  0x16   :  { %59 = dma.hbm_to_vmem [thread:$0]  %s55_s30, 16, %s57_s0, [#allocation6]  }
  0x17   :  { %s79_s25 = sshll.u32 %s2300_s6, 4  ;;  %s2863_s26 = smov 16   ;;  %s80_s25 = int_to_ptr.vmem [resolvable:$true] %s79_s25 }
  0x18   :  { %s2865_s2 = smov 1   ;;  %s109_s28 = sshll.u32 %s2849_s11, 4  ;;  %s110_s28 = int_to_ptr.hbm [resolvable:$true] %s109_s28 }
  0x19   :  { %s2303_s29 = smov [#allocation11]   ;;  %s143_s0 = sshll.u32 %s2855_s17, 4  ;;  %s144_s0 = int_to_ptr.hbm [resolvable:$true] %s143_s0 }
  0x1a   :  { %s77_s24 = sshll.u32 %s2875_s5, 4  ;;  %s111_s4 = sshll.u32 %s2303_s29, 4  ;;  %s78_s24 = int_to_ptr.hbm [resolvable:$true] %s77_s24  ;;  %s112_s4 = int_to_ptr.vmem [resolvable:$true] %s111_s4 }
  0x1b   :  { %85 = dma.hbm_to_vmem [thread:$0]  %s78_s24, 32, %s80_s25, [#allocation9], %s2863_s26, %s2863_s26, %s2865_s2  }
  0x1c   :  { %s2304_s1 = smov 128   ;;  %s2305_s5 = smov 8  }
  0x1d   :  { %117 = dma.hbm_to_vmem [thread:$0]  %s110_s28, 1024, %s112_s4, [#allocation12], %s2304_s1, %s2304_s1, %s2305_s5  }
  0x1e   :  { %s2306_s24 = smov [#allocation14]   ;;  %s2876_s11 = sld [smem:[#allocation29_spill]] }
  0x1f   :  { %s145_s6 = sshll.u32 %s2306_s24, 4  ;;  %s2877_s23 = sld [smem:[#allocation31_spill]]  ;;  %s146_s6 = int_to_ptr.vmem [resolvable:$true] %s145_s6 }
  0x20   :  { %151 = dma.hbm_to_vmem [thread:$0]  %s144_s0, 512, %s146_s6, [#allocation15], %s2304_s1, %s2304_s1, %s2305_s5  }
  0x21   :  { %s2307_s26 = smov [#allocation2]   ;;  %s2308_s28 = smov [#allocation7]  }
  0x22   :  { %s45_s2 = sshll.u32 %s2307_s26, 4  ;;  %s67_s4 = sshll.u32 %s2308_s28, 4  ;;  %s46_s2 = int_to_ptr.vmem [resolvable:$true] %s45_s2  ;;  %s68_s4 = int_to_ptr.vmem [resolvable:$true] %s67_s4 }
  0x23   :  { %s94_s27 = sshll.u32 %s2847_s9, 4  ;;  %s128_s6 = sshll.u32 %s2853_s15, 4  ;;  %s95_s27 = int_to_ptr.hbm [resolvable:$true] %s94_s27  ;;  %s129_s6 = int_to_ptr.hbm [resolvable:$true] %s128_s6 }
  0x24   :  { %s43_s3 = sshll.u32 %s2876_s11, 4  ;;  %s2309_s17 = smov [#allocation10]   ;;  %s44_s3 = int_to_ptr.hbm [resolvable:$true] %s43_s3 }
  0x25   :  { %s65_s30 = sshll.u32 %s2877_s23, 4  ;;  %s96_s29 = sshll.u32 %s2309_s17, 4  ;;  %s66_s30 = int_to_ptr.hbm [resolvable:$true] %s65_s30  ;;  %s97_s29 = int_to_ptr.vmem [resolvable:$true] %s96_s29 }
  0x26   :  { %48 = dma.hbm_to_vmem [thread:$0]  %s44_s3, 16, %s46_s2, [#allocation3]  }
  0x27   :  { %70 = dma.hbm_to_vmem [thread:$0]  %s66_s30, 16, %s68_s4, [#allocation6]  }
  0x28   :  { %s2878_s26 = smov 1   ;;  %s2879_s23 = smov 16  }
  0x29   :  { %102 = dma.hbm_to_vmem [thread:$0]  %s95_s27, 32, %s97_s29, [#allocation9], %s2879_s23, %s2879_s23, %s2878_s26  }
  0x2a   :  { %s2310_s2 = smov [#allocation13]   ;;  %s156_s9 = sshll.u32 %s2856_s18, 4  ;;  %s157_s9 = int_to_ptr.hbm [resolvable:$true] %s156_s9 }
  0x2b   :  { %s130_s3 = sshll.u32 %s2310_s2, 4  ;;  %s171_s4 = sshll.u32 %s2858_s20, 4  ;;  %s131_s3 = int_to_ptr.vmem [resolvable:$true] %s130_s3  ;;  %s172_s4 = int_to_ptr.hbm [resolvable:$true] %s171_s4 }
  0x2c   :  { %136 = dma.hbm_to_vmem [thread:$0]  %s129_s6, 32, %s131_s3, [#allocation12], %s2879_s23, %s2879_s23, %s2878_s26  }
  0x2d   :  { %s2311_s25 = smov [#allocation16]   ;;  %s2312_s27 = smov [#allocation17]  }
  0x2e   :  { %s158_s11 = sshll.u32 %s2311_s25, 4  ;;  %s173_s18 = sshll.u32 %s2312_s27, 4  ;;  %s159_s11 = int_to_ptr.vmem [resolvable:$true] %s158_s11  ;;  %s174_s18 = int_to_ptr.vmem [resolvable:$true] %s173_s18 }
  0x2f   :  { %164 = dma.hbm_to_vmem [thread:$0]  %s157_s9, 256, %s159_s11, [#allocation15], %s2304_s1, %s2304_s1, %s2305_s5  }
  0x30   :  { %179 = dma.hbm_to_vmem [thread:$0]  %s172_s4, 1024, %s174_s18, [#allocation18], %s2304_s1, %s2304_s1, %s2305_s5  }
  0x31   :  { %2285 = dma.done.wait [#allocation3], 16  }
  0x32   :  { %2286 = vsyncadd [#allocation3], 4294967280 }
  0x33   :  { %2287 = dma.done.wait [#allocation6], 32  }
  0x34   :  { %2288 = vsyncadd [#allocation6], 4294967264 }
  0x35   :  { %2289 = dma.done.wait [#allocation9], 64  }
  0x36   :  { %2290 = vsyncadd [#allocation9], 4294967232 }
  0x37   :  { %2291 = dma.done.wait [#allocation12], 1056  }
  0x38   :  { %2292 = vsyncadd [#allocation12], 4294966240 }
  0x39   :  { %2293 = dma.done.wait [#allocation15], 768  }
  0x3a   :  { %2294 = vsyncadd [#allocation15], 4294966528 }
  0x3b   :  { %2295 = dma.done.wait [#allocation18], 1024  }
  0x3c   :  { %2296 = vsyncadd [#allocation18], 4294966272  ;;  %s2880_s6 = sld [smem:[#allocation28_spill]]  ;;  %vm235_vm0 = vcmask 523264   ;;  %v1936_v9 = vld [vmem:[#allocation2] ss:$0 sm:$0xff] }
  0x3d   :  { %s2881_s18 = sld [smem:[#allocation27_spill]]  ;;  %s2313_s20 = smov 64   ;;  %vm285_vm1 = vcmask 1040384   ;;  %vm287_vm2 = vcmask 1041408   ;;  %vm289_vm3 = vcmask 1042432   ;;  %vm291_vm4 = vcmask 1043456  }
  0x3e   :  { %s2314_s0 = smov 32   ;;  %vm293_vm5 = vcmask 1044480   ;;  %vm295_vm6 = vcmask 1045504   ;;  %vm297_vm7 = vcmask 1046528   ;;  %vm301_vm8 = vcmask 261120   ;;  %s2882_s1 = sld [smem:[#allocation32_spill]] }
  0x3f   :  { %v2316_v32 = vmov 32.0   ;;  %v1937_v57 = vld [vmem:[#allocation5] ss:$0 sm:$0xff]  ;;  %v1938_v60 = vld [vmem:[#allocation7] ss:$0 sm:$0xff]  ;;  %s2317_s9 = smov 80  }
  0x40   :  { %1957 = vrcp.f32 %v2316_v32  ;;  %v1939_v63 = vld [vmem:[#allocation8] ss:$0 sm:$0xff]  ;;  %s2318_s15 = smov 112   ;;  %vm397_vm13 = vcmask 130048   ;;  %vm516_vm14 = vcmask 31744   ;;  %s2319_s30 = smov 48  }
  0x41   :  { %s1822_s5 = sshll.u32 %s2860_s22, 4  ;;  %s1823_s5 = int_to_ptr.hbm [resolvable:$true] %s1822_s5 }
  0x42   :  { %v230_v0 = vld [vmem:[%s2880_s6 + $0x38] sm:$0xff]  ;;  %v229_v1 = vld [vmem:[%s2880_s6 + $0x30] sm:$0xff]  ;;  %v228_v2 = vld [vmem:[%s2880_s6 + $0x28] sm:$0xff] }
  0x43   :  { %247 = vmatpush.msra.mxu0 %v230_v0  ;;  %v227_v3 = vld [vmem:[%s2880_s6 + $0x20] sm:$0xff]  ;;  %v226_v4 = vld [vmem:[%s2880_s6 + $0x18] sm:$0xff]  ;;  %v225_v5 = vld [vmem:[%s2880_s6 + $0x10] sm:$0xff] }
  0x44   :  { %v224_v6 = vld [vmem:[%s2880_s6 + $0x8] sm:$0xff]  ;;  %v223_v7 = vld [vmem:[%s2880_s6] sm:$0xff]  ;;  %s2315_s6 = smov 96   ;;  %v342_v44 = vld [vmem:[%s2882_s1 + $0x18] sm:$0xff] }
  0x45   :  { %248 = vmatpush.msra.mxu0 %v229_v1  ;;  %v222_v8 = vld [vmem:[%s2881_s18] sm:$0x3]  ;;  %385 = vmatpush.msra.mxu1 %v342_v44  ;;  %v341_v45 = vld [vmem:[%s2882_s1 + $0x10] sm:$0xff]  ;;  %v340_v46 = vld [vmem:[%s2882_s1 + $0x8] sm:$0xff] }
  0x46   :  { %v1958_v33 = vpop.eup %1957  ;;  %v339_v47 = vld [vmem:[%s2882_s1] sm:$0xff] }
  0x47   :  { %249 = vmatpush.msra.mxu0 %v228_v2  ;;  %v306_v34 = vmul.f32 32.0, %v1958_v33  ;;  %vm310_vm9 = vweird.f32 %v1958_v33  ;;  %386 = vmatpush.msra.mxu1 %v341_v45 }
  0x49   :  { %250 = vmatpush.msra.mxu0 %v227_v3  ;;  %v307_v35 = vsub.f32 1.0, %v306_v34  ;;  %387 = vmatpush.msra.mxu1 %v340_v46 }
  0x4b   :  { %251 = vmatpush.msra.mxu0 %v226_v4  ;;  %v308_v36 = vmul.f32 %v1958_v33, %v307_v35  ;;  %388 = vmatpush.msra.mxu1 %v339_v47 }
  0x4d   :  { %252 = vmatpush.msra.mxu0 %v225_v5  ;;  %v309_v37 = vadd.f32 %v1958_v33, %v308_v36 }
  0x4f   :  { %253 = vmatpush.msra.mxu0 %v224_v6  ;;  %v2523_v38 = vsel %vm310_vm9, %v1958_v33, %v309_v37 }
  0x51   :  { %254 = vmatpush.msra.mxu0 %v223_v7 }
  0x52   :  { %1837 = vmatmul.msk.f32.vlgmr.msra.gmra.mxu0 %vm235_vm0, %v222_v8 }
  0xcf   :  { %v256_v10 = vpop.f32.mrf.mxu0 }
  0xd0   :  { %v257_v11 = vadd.f32 %v1936_v9, %v256_v10 }
  0xd2   :  { %v277_v12 = vrot.slane %v257_v11, 3  ;;  %v268_v13 = vrot.slane %v257_v11, 5  ;;  %v260_v14 = vrot.slane %v257_v11, 7  ;;  %v281_v15 = vrot.slane %v257_v11, 2 }
  0xd3   :  { %v273_v16 = vrot.slane %v257_v11, 4  ;;  %v264_v17 = vrot.slane %v257_v11, 6 }
  0xd4   :  { %278 = vrot.lane.b32.xlu2 %v277_v12, %s2313_s20  ;;  %269 = vrot.lane.b32.xlu1 %v268_v13, %s2314_s0 }
  0xd5   :  { %261 = vrot.lane.b32.xlu0 %v260_v14, %s2315_s6 }
  0xdc   :  { %282 = vrot.lane.b32.xlu2 %v281_v15, %s2314_s0  ;;  %274 = vrot.lane.b32.xlu1 %v273_v16, %s2315_s6 }
  0xdd   :  { %265 = vrot.lane.b32.xlu0 %v264_v17, %s2313_s20 }
 0x12e   :  { %v279_v20 = vpop.permute.xlu2 %278 }
 0x136   :  { %v283_v28 = vpop.permute.xlu2 %282 }
 0x146   :  { %v270_v19 = vpop.permute.xlu1 %269 }
 0x147   :  { %v262_v18 = vpop.permute.xlu0 %261 }
 0x148   :  { %v286_v21 = vsel %vm285_vm1, %v257_v11, %v262_v18 }
 0x14e   :  { %v275_v25 = vpop.permute.xlu1 %274 }
 0x14f   :  { %v266_v22 = vpop.permute.xlu0 %265 }
 0x150   :  { %v288_v23 = vsel %vm287_vm2, %v286_v21, %v266_v22 }
 0x151   :  { %v290_v24 = vsel %vm289_vm3, %v288_v23, %v270_v19 }
 0x152   :  { %v292_v26 = vsel %vm291_vm4, %v290_v24, %v268_v13 }
 0x153   :  { %v294_v27 = vsel %vm293_vm5, %v292_v26, %v275_v25 }
 0x154   :  { %v296_v29 = vsel %vm295_vm6, %v294_v27, %v279_v20 }
 0x155   :  { %v298_v30 = vsel %vm297_vm7, %v296_v29, %v283_v28 }
 0x156   :  { %v302_v31 = vsel %vm301_vm8, %v298_v30, 0.0 }
 0x157   :  { %303 = vadd.xlane.f32.xlu0 %v302_v31 }
 0x1ca   :  { %v304_v39 = vpop.xlane.xlu0 %303 }
 0x1cb   :  { %v312_v40 = vmul.f32 %v2523_v38, %v304_v39 }
 0x1cd   :  { %v313_v41 = vsub.f32 %v298_v30, %v312_v40 }
 0x1cf   :  { %v314_v42 = vmul.f32 %v313_v41, %v313_v41 }
 0x1d1   :  { %v315_v43 = vsel %vm301_vm8, %v314_v42, 0.0 }
 0x1d2   :  { %316 = vadd.xlane.f32.xlu1 %v315_v43 }
 0x245   :  { %v317_v48 = vpop.xlane.xlu1 %316 }
 0x246   :  { %v318_v49 = vmul.f32 %v317_v48, %v2523_v38 }
 0x248   :  { %v319_v50 = vadd.f32 1e-12, %v318_v49 }
 0x24a   :  { %1959 = vrsqrt.f32 %v319_v50  ;;  %vm326_vm11 = vweird.f32 %v319_v50 }
 0x250   :  { %v1960_v51 = vpop.eup %1959 }
 0x251   :  { %v321_v52 = vmul.f32 %v1960_v51, %v319_v50  ;;  %vm327_vm10 = vweird.f32 %v1960_v51 }
 0x252   :  { %vm328_vm12 = vmor %vm326_vm11, %vm327_vm10 }
 0x253   :  { %v322_v53 = vmul.f32 %v1960_v51, %v321_v52 }
 0x255   :  { %v323_v54 = vmul.f32 0.5, %v322_v53 }
 0x257   :  { %v324_v55 = vsub.f32 1.5, %v323_v54 }
 0x259   :  { %v325_v56 = vmul.f32 %v1960_v51, %v324_v55 }
 0x25b   :  { %v329_v58 = vsel %vm328_vm12, %v1960_v51, %v325_v56 }
 0x25c   :  { %v330_v59 = vmul.f32 %v329_v58, %v313_v41 }
 0x25e   :  { %v334_v61 = vmul.f32 %v1937_v57, %v330_v59 }
 0x260   :  { %v2540_v62 = vadd.f32 %v1938_v60, %v334_v61 }
 0x262   :  { %1838 = vmatmul.msk.f32.vlgmr.msra.gmra.mxu1 %vm301_vm8, %v2540_v62 }
 0x2df   :  { %v390_v0 = vpop.f32.mrf.mxu1 }
 0x2e0   :  { %v2544_v1 = vadd.f32 %v1939_v63, %v390_v0 }
 0x2e2   :  { %395 = vrot.lane.b32.xlu2 %v2544_v1, %s2315_s6  ;;  %v394_v2 = vrot.slane %v2544_v1, 4 }
 0x2ea   :  { %452 = vrot.lane.b32.xlu2 %v2544_v1, %s2317_s9 }
 0x2f2   :  { %450 = vrot.lane.b32.xlu2 %v2544_v1, %s2318_s15 }
 0x2fa   :  { %422 = vrot.lane.b32.xlu2 %v394_v2, %s2315_s6 }
 0x302   :  { %480 = vrot.lane.b32.xlu2 %v394_v2, %s2317_s9 }
 0x30a   :  { %478 = vrot.lane.b32.xlu2 %v394_v2, %s2318_s15 }
 0x33c   :  { %v396_v3 = vpop.permute.xlu2 %395 }
 0x33d   :  { %1839 = vmatpush.xpose.msk.msra.mxu2 %vm397_vm13, %v396_v3  ;;  %v347_v3 = vld [vmem:[%s2845_s7 + $0x18] sm:$0xff] }
 0x340   :  { %1840 = vmatmul.msk.f32.vlgmr.msra.gmra.mxu2 %vm397_vm13, %v2544_v1 }
 0x344   :  { %v453_v4 = vpop.permute.xlu2 %452 }
 0x345   :  { %1843 = vmatpush.xpose.msk.msrb.mxu2 %vm397_vm13, %v453_v4  ;;  %v346_v4 = vld [vmem:[%s2845_s7 + $0x10] sm:$0xff] }
 0x34c   :  { %v451_v5 = vpop.permute.xlu2 %450 }
 0x34d   :  { %1844 = vmatmul.msk.f32.vlgmr.msrb.gmra.mxu2 %vm397_vm13, %v451_v5  ;;  %v345_v5 = vld [vmem:[%s2845_s7 + $0x8] sm:$0xff] }
 0x354   :  { %v423_v6 = vpop.permute.xlu2 %422 }
 0x355   :  { %1841 = vmatpush.xpose.msk.msra.mxu3 %vm397_vm13, %v423_v6  ;;  %v344_v6 = vld [vmem:[%s2845_s7] sm:$0xff] }
 0x358   :  { %1842 = vmatmul.msk.f32.vlgmr.msra.gmra.mxu3 %vm397_vm13, %v394_v2 }
 0x35c   :  { %v481_v7 = vpop.permute.xlu2 %480 }
 0x35d   :  { %1845 = vmatpush.xpose.msk.msrb.mxu3 %vm397_vm13, %v481_v7 }
 0x364   :  { %v479_v8 = vpop.permute.xlu2 %478 }
 0x365   :  { %1846 = vmatmul.msk.f32.vlgmr.msrb.gmra.mxu3 %vm397_vm13, %v479_v8 }
 0x3c3   :  { %v419_v9 = vpop.f32.mrf.mxu2 }
 0x3c4   :  { %v448_v12 = vmul.f32 0.25, %v419_v9 }
 0x3d0   :  { %v475_v10 = vpop.f32.mrf.mxu2 }
 0x3d1   :  { %v506_v11 = vmul.f32 0.25, %v475_v10 }
 0x3d3   :  { %v510_v13 = vrot.slane %v506_v11, 4 }
 0x3d5   :  { %v514_v14 = vsel %vm291_vm4, %v448_v12, %v510_v13 }
 0x3d6   :  { %v517_v15 = vsel %vm516_vm14, %v514_v14, -inf }
 0x3d7   :  { %518 = vmax.xlane.f32.xlu0 %v517_v15  ;;  %v1940_v15 = vld [vmem:[%s2846_s8] ss:$0 sm:$0xff] }
 0x3db   :  { %v445_v16 = vpop.f32.mrf.mxu3 }
 0x3dc   :  { %v449_v19 = vmul.f32 0.25, %v445_v16 }
 0x3e8   :  { %v503_v17 = vpop.f32.mrf.mxu3 }
 0x3e9   :  { %v507_v18 = vmul.f32 0.25, %v503_v17 }
 0x3eb   :  { %v511_v20 = vrot.slane %v507_v18, 4 }
 0x3ed   :  { %v515_v21 = vsel %vm291_vm4, %v449_v19, %v511_v20 }
 0x3ee   :  { %v520_v22 = vsel %vm516_vm14, %v515_v21, -inf }
 0x3ef   :  { %521 = vmax.xlane.f32.xlu1 %v520_v22 }
 0x408   :  { %620 = vrot.lane.b32.xlu1 %v2544_v1, %s2319_s30 }
 0x410   :  { %592 = vrot.lane.b32.xlu1 %v394_v2, %s2313_s20 }
 0x44a   :  { %v519_v23 = vpop.xlane.xlu0 %518 }
 0x44b   :  { %v523_v24 = vsub.f32 %v514_v14, %v519_v23 }
 0x44d   :  { %v525_v25 = vmul.f32 1.442695, %v523_v24 }
 0x44f   :  { %1961 = vpow2.f32 %v525_v25  ;;  %v354_v25 = vld [vmem:[#allocation11 + $0x18] sm:$0xff] }
 0x455   :  { %v1962_v26 = vpop.eup %1961 }
 0x456   :  { %v529_v27 = vsel %vm516_vm14, %v1962_v26, 0.0 }
 0x457   :  { %530 = vadd.xlane.f32.xlu2 %v529_v27  ;;  %v352_v27 = vld [vmem:[#allocation11 + $0x8] sm:$0xff] }
 0x462   :  { %v522_v28 = vpop.xlane.xlu1 %521 }
 0x463   :  { %v524_v29 = vsub.f32 %v515_v21, %v522_v28  ;;  %v351_v28 = vld [vmem:[#allocation11] sm:$0xff] }
 0x465   :  { %v527_v30 = vmul.f32 1.442695, %v524_v29 }
 0x467   :  { %1963 = vpow2.f32 %v527_v30 }
 0x46d   :  { %v1964_v31 = vpop.eup %1963 }
 0x46e   :  { %v532_v32 = vsel %vm516_vm14, %v1964_v31, 0.0 }
 0x46f   :  { %533 = vadd.xlane.f32.xlu0 %v532_v32 }
 0x47a   :  { %v621_v33 = vpop.permute.xlu1 %620 }
 0x47b   :  { %1851 = vmatpush.msk.msra.mxu3 %vm291_vm4, %v621_v33 }
 0x482   :  { %v593_v34 = vpop.permute.xlu1 %592 }
 0x483   :  { %647 = vrot.lane.b32.xlu0 %v394_v2, %s2319_s30  ;;  %1849 = vmatpush.msk.msra.mxu2 %vm291_vm4, %v593_v34 }
 0x485   :  { %762 = vmatpush.msrb.mxu2 %v354_v25 }
 0x48b   :  { %565 = vrot.lane.b32.xlu0 %v2544_v1, %s2313_s20 }
 0x4ca   :  { %v531_v35 = vpop.xlane.xlu2 %530 }
 0x4cb   :  { %1965 = vrcp.f32 %v531_v35  ;;  %v546_v40 = vand.u32 2147483648, %v531_v35  ;;  %v544_v42 = vand.u32 2147483647, %v531_v35  ;;  %vm540_vm2 = vweird.f32 %v531_v35 }
 0x4cd   :  { %v547_v44 = vor.u32 1.1754944e-38, %v546_v40  ;;  %vm545_vm5 = vcmp.eq.f32.partialorder %v544_v42, 8.507059e+37 }
 0x4d1   :  { %v1966_v36 = vpop.eup %1965 }
 0x4d2   :  { %v536_v37 = vmul.f32 %v1966_v36, %v531_v35  ;;  %vm541_vm15 = vweird.f32 %v1966_v36 }
 0x4d3   :  { %vm542_vm3 = vmor %vm540_vm2, %vm541_vm15 }
 0x4d4   :  { %v537_v39 = vsub.f32 1.0, %v536_v37  ;;  %v1941_v37 = vld [vmem:[#allocation10] ss:$0 sm:$0xff] }
 0x4d6   :  { %v538_v41 = vmul.f32 %v1966_v36, %v537_v39 }
 0x4d8   :  { %v539_v43 = vadd.f32 %v1966_v36, %v538_v41  ;;  %v1942_v41 = vld [vmem:[%s2848_s10] ss:$0 sm:$0xff] }
 0x4da   :  { %v543_v45 = vsel %vm542_vm3, %v1966_v36, %v539_v43 }
 0x4db   :  { %v548_v46 = vsel %vm545_vm5, %v547_v44, %v543_v45  ;;  %v1943_v44 = vld [vmem:[%s2850_s12] ss:$0 sm:$0xff] }
 0x4dc   :  { %v549_v47 = vmul.f32 %v1962_v26, %v548_v46  ;;  %v353_v26 = vld [vmem:[#allocation11 + $0x10] sm:$0xff] }
 0x4dd   :  { %763 = vmatpush.msrb.mxu2 %v353_v26 }
 0x4de   :  { %v619_v48 = vrot.slane %v549_v47, 4 }
 0x4df   :  { %764 = vmatpush.msrb.mxu2 %v352_v27 }
 0x4e0   :  { %1852 = vmatmul.msk.f32.vlgmr.msra.gmra.mxu3 %vm516_vm14, %v619_v48 }
 0x4e1   :  { %765 = vmatpush.msrb.mxu2 %v351_v28 }
 0x4e2   :  { %v534_v49 = vpop.xlane.xlu0 %533 }
 0x4e3   :  { %1967 = vrcp.f32 %v534_v49  ;;  %v561_v53 = vand.u32 2147483648, %v534_v49  ;;  %v559_v55 = vand.u32 2147483647, %v534_v49  ;;  %vm555_vm7 = vweird.f32 %v534_v49 }
 0x4e5   :  { %v562_v57 = vor.u32 1.1754944e-38, %v561_v53  ;;  %vm560_vm10 = vcmp.eq.f32.partialorder %v559_v55, 8.507059e+37  ;;  %v362_v53 = vld [vmem:[%s2851_s13 + $0x30] sm:$0xff] }
 0x4e9   :  { %v1968_v50 = vpop.eup %1967 }
 0x4ea   :  { %v551_v51 = vmul.f32 %v1968_v50, %v534_v49  ;;  %vm556_vm6 = vweird.f32 %v1968_v50 }
 0x4eb   :  { %vm557_vm9 = vmor %vm555_vm7, %vm556_vm6 }
 0x4ec   :  { %v552_v52 = vsub.f32 1.0, %v551_v51 }
 0x4ee   :  { %v553_v54 = vmul.f32 %v1968_v50, %v552_v52 }
 0x4f0   :  { %v554_v56 = vadd.f32 %v1968_v50, %v553_v54 }
 0x4f2   :  { %v558_v58 = vsel %vm557_vm9, %v1968_v50, %v554_v56  ;;  %v363_v50 = vld [vmem:[%s2851_s13 + $0x38] sm:$0xff]  ;;  %v361_v56 = vld [vmem:[%s2851_s13 + $0x28] sm:$0xff] }
 0x4f3   :  { %v563_v59 = vsel %vm560_vm10, %v562_v57, %v558_v58  ;;  %828 = vmatpush.msrb.mxu3 %v363_v50 }
 0x4f4   :  { %v564_v60 = vmul.f32 %v1964_v31, %v563_v59  ;;  %v360_v59 = vld [vmem:[%s2851_s13 + $0x20] sm:$0xff] }
 0x4f5   :  { %v648_v61 = vpop.permute.xlu0 %647  ;;  %829 = vmatpush.msrb.mxu3 %v362_v53 }
 0x4f6   :  { %1850 = vmatmul.msk.f32.vlgmr.msra.gmra.mxu2 %vm516_vm14, %v564_v60  ;;  %1853 = vmatpush.msk.msrb.mxu0 %vm291_vm4, %v648_v61  ;;  %v646_v63 = vrot.slane %v564_v60, 4  ;;  %v359_v61 = vld [vmem:[%s2851_s13 + $0x18] sm:$0xff] }
 0x4f7   :  { %830 = vmatpush.msrb.mxu3 %v361_v56 }
 0x4f8   :  { %1854 = vmatmul.msk.f32.vlgmr.msrb.gmra.mxu0 %vm516_vm14, %v646_v63 }
 0x4f9   :  { %831 = vmatpush.msrb.mxu3 %v360_v59 }
 0x4fb   :  { %832 = vmatpush.msrb.mxu3 %v359_v61 }
 0x4fd   :  { %v566_v0 = vpop.permute.xlu0 %565 }
 0x4fe   :  { %1847 = vmatpush.msk.msrb.mxu1 %vm291_vm4, %v566_v0 }
 0x4ff   :  { %1848 = vmatmul.msk.f32.vlgmr.msrb.gmra.mxu1 %vm516_vm14, %v549_v47 }
 0x500   :  { %705 = vmatpush.msra.mxu1 %v347_v3  ;;  %v357_v3 = vld [vmem:[%s2851_s13 + $0x8] sm:$0xff] }
 0x502   :  { %706 = vmatpush.msra.mxu1 %v346_v4 }
 0x504   :  { %707 = vmatpush.msra.mxu1 %v345_v5  ;;  %v356_v5 = vld [vmem:[%s2851_s13] sm:$0xff] }
 0x506   :  { %708 = vmatpush.msra.mxu1 %v344_v6 }
 0x563   :  { %v643_v1 = vpop.f32.mrf.mxu3 }
 0x564   :  { %675 = vrot.lane.b32.xlu0 %v643_v1, %s2879_s23  ;;  %v358_v1 = vld [vmem:[%s2851_s13 + $0x10] sm:$0xff] }
 0x565   :  { %833 = vmatpush.msrb.mxu3 %v358_v1 }
 0x567   :  { %834 = vmatpush.msrb.mxu3 %v357_v3 }
 0x569   :  { %835 = vmatpush.msrb.mxu3 %v356_v5 }
 0x575   :  { %v670_v2 = vpop.f32.mrf.mxu0 }
 0x576   :  { %677 = vrot.lane.b32.xlu1 %v670_v2, %s2879_s23 }
 0x579   :  { %v616_v7 = vpop.f32.mrf.mxu2 }
 0x57c   :  { %v589_v11 = vpop.f32.mrf.mxu1 }
 0x5d6   :  { %v676_v8 = vpop.permute.xlu0 %675 }
 0x5d7   :  { %v681_v13 = vsel %vm397_vm13, %v589_v11, %v676_v8 }
 0x5e8   :  { %v678_v9 = vpop.permute.xlu1 %677 }
 0x5e9   :  { %v682_v10 = vsel %vm397_vm13, %v616_v7, %v678_v9 }
 0x5ea   :  { %v684_v12 = vrot.slane %v682_v10, 4 }
 0x5ec   :  { %v686_v14 = vsel %vm291_vm4, %v681_v13, %v684_v12 }
 0x5ed   :  { %1855 = vmatmul.msk.f32.vlgmr.msra.gmra.mxu1 %vm301_vm8, %v686_v14 }
 0x66a   :  { %v710_v16 = vpop.f32.mrf.mxu1 }
 0x66b   :  { %v711_v17 = vadd.f32 %v1940_v15, %v710_v16 }
 0x66d   :  { %v713_v18 = vadd.f32 %v711_v17, %v2540_v62 }
 0x66f   :  { %v714_v19 = vsel %vm301_vm8, %v713_v18, 0.0 }
 0x670   :  { %715 = vadd.xlane.f32.xlu2 %v714_v19 }
 0x6e3   :  { %v716_v20 = vpop.xlane.xlu2 %715 }
 0x6e4   :  { %v717_v21 = vmul.f32 %v716_v20, %v2523_v38 }
 0x6e6   :  { %v718_v22 = vsub.f32 %v713_v18, %v717_v21 }
 0x6e8   :  { %v719_v23 = vmul.f32 %v718_v22, %v718_v22 }
 0x6ea   :  { %v720_v24 = vsel %vm301_vm8, %v719_v23, 0.0 }
 0x6eb   :  { %721 = vadd.xlane.f32.xlu1 %v720_v24 }
 0x75e   :  { %v722_v62 = vpop.xlane.xlu1 %721 }
 0x75f   :  { %v723_v29 = vmul.f32 %v722_v62, %v2523_v38 }
 0x761   :  { %v724_v30 = vadd.f32 1e-12, %v723_v29 }
 0x763   :  { %1969 = vrsqrt.f32 %v724_v30  ;;  %vm731_vm12 = vweird.f32 %v724_v30 }
 0x769   :  { %v1970_v31 = vpop.eup %1969 }
 0x76a   :  { %v726_v32 = vmul.f32 %v1970_v31, %v724_v30  ;;  %vm732_vm11 = vweird.f32 %v1970_v31  ;;  %v1944_v30 = vld [vmem:[%s2852_s14] ss:$0 sm:$0xff] }
 0x76b   :  { %vm733_vm15 = vmor %vm731_vm12, %vm732_vm11 }
 0x76c   :  { %v727_v33 = vmul.f32 %v1970_v31, %v726_v32 }
 0x76e   :  { %v728_v34 = vmul.f32 0.5, %v727_v33 }
 0x770   :  { %v729_v35 = vsub.f32 1.5, %v728_v34 }
 0x772   :  { %v730_v36 = vmul.f32 %v1970_v31, %v729_v35 }
 0x774   :  { %v734_v39 = vsel %vm733_vm15, %v1970_v31, %v730_v36 }
 0x775   :  { %v735_v40 = vmul.f32 %v734_v39, %v718_v22 }
 0x777   :  { %v739_v42 = vmul.f32 %v1941_v37, %v735_v40 }
 0x779   :  { %v2614_v43 = vadd.f32 %v1942_v41, %v739_v42  ;;  %v1862_v41 = vld [vmem:[%s2882_s1 + $0x38] sm:$0xff]  ;;  %v1861_v42 = vld [vmem:[%s2882_s1 + $0x30] sm:$0xff] }
 0x77a   :  { %929 = vmatpush.msra.mxu0 %v1862_v41 }
 0x77b   :  { %1856 = vmatmul.msk.f32.vlgmr.msrb.gmra.mxu2 %vm301_vm8, %v2614_v43 }
 0x77c   :  { %930 = vmatpush.msra.mxu0 %v1861_v42 }
 0x7fe   :  { %v767_v45 = vpop.f32.mrf.mxu2 }
 0x7ff   :  { %v768_v46 = vadd.f32 %v1943_v44, %v767_v45  ;;  %v1859_v44 = vld [vmem:[%s2882_s1 + $0x20] sm:$0xff] }
 0x801   :  { %v771_v47 = vmul.f32 0.70710677, %v768_v46  ;;  %v770_v28 = vmul.f32 0.5, %v768_v46 }
 0x803   :  { %v772_v48 = vmul.f32 %v771_v47, %v771_v47 }
 0x805   :  { %v773_v49 = vmin.f32 %v772_v48, 16.0 }
 0x807   :  { %v774_v51 = vmul.f32 2.1237322e-06, %v773_v49  ;;  %v785_v52 = vmul.f32 3.8918573e-05, %v773_v49 }
 0x809   :  { %v775_v54 = vadd.f32 0.00028619796, %v774_v51  ;;  %v786_v55 = vadd.f32 0.001143296, %v785_v52 }
 0x80b   :  { %v776_v57 = vmul.f32 %v775_v54, %v773_v49  ;;  %v787_v58 = vmul.f32 %v786_v55, %v773_v49  ;;  %v1945_v54 = vld [vmem:[#allocation13] ss:$0 sm:$0xff] }
 0x80d   :  { %v788_v60 = vadd.f32 0.014752088, %v787_v58  ;;  %v777_v63 = vadd.f32 0.0036580483, %v776_v57  ;;  %v1946_v57 = vld [vmem:[%s2854_s16] ss:$0 sm:$0xff] }
 0x80f   :  { %v789_v0 = vmul.f32 %v788_v60, %v773_v49  ;;  %v778_v4 = vmul.f32 %v777_v63, %v773_v49  ;;  %v1947_v60 = vld [vmem:[#allocation8 + $0x1] ss:$0 sm:$0xff] }
 0x811   :  { %v790_v2 = vadd.f32 0.112945676, %v789_v0  ;;  %v779_v8 = vadd.f32 0.05243302, %v778_v4 }
 0x813   :  { %v791_v6 = vmul.f32 %v790_v2, %v773_v49  ;;  %v780_v11 = vmul.f32 %v779_v8, %v773_v49 }
 0x815   :  { %v792_v7 = vadd.f32 0.4994258, %v791_v6  ;;  %v781_v12 = vadd.f32 0.18741608, %v780_v11 }
 0x817   :  { %v793_v9 = vmul.f32 %v792_v7, %v773_v49  ;;  %v782_v14 = vmul.f32 %v781_v12, %v773_v49 }
 0x819   :  { %v794_v10 = vadd.f32 1.0, %v793_v9  ;;  %v783_v18 = vadd.f32 1.1283791, %v782_v14 }
 0x81b   :  { %1971 = vrcp.f32 %v794_v10  ;;  %v806_v17 = vand.u32 2147483648, %v794_v10  ;;  %v804_v20 = vand.u32 2147483647, %v794_v10  ;;  %vm800_vm3 = vweird.f32 %v794_v10 }
 0x81c   :  { %v784_v23 = vmul.f32 %v783_v18, %v771_v47 }
 0x81d   :  { %v807_v22 = vor.u32 1.1754944e-38, %v806_v17  ;;  %vm805_vm6 = vcmp.eq.f32.partialorder %v804_v20, 8.507059e+37 }
 0x821   :  { %v1972_v13 = vpop.eup %1971 }
 0x822   :  { %v796_v15 = vmul.f32 %v1972_v13, %v794_v10  ;;  %vm801_vm2 = vweird.f32 %v1972_v13 }
 0x823   :  { %vm802_vm5 = vmor %vm800_vm3, %vm801_vm2 }
 0x824   :  { %v797_v16 = vsub.f32 1.0, %v796_v15 }
 0x826   :  { %v798_v19 = vmul.f32 %v1972_v13, %v797_v16 }
 0x828   :  { %v799_v21 = vadd.f32 %v1972_v13, %v798_v19 }
 0x82a   :  { %v803_v24 = vsel %vm802_vm5, %v1972_v13, %v799_v21 }
 0x82b   :  { %v808_v25 = vsel %vm805_vm6, %v807_v22, %v803_v24 }
 0x82c   :  { %v809_v26 = vmul.f32 %v808_v25, %v784_v23 }
 0x82e   :  { %v1857_v27 = vclamps-f32 %v809_v26, 1.0 }
 0x830   :  { %v812_v62 = vadd.f32 1.0, %v1857_v27 }
 0x832   :  { %v813_v29 = vmul.f32 %v812_v62, %v770_v28 }
 0x834   :  { %1858 = vmatmul.msk.f32.vlgmr.msrb.gmra.mxu3 %vm235_vm0, %v813_v29 }
 0x8b7   :  { %v837_v31 = vpop.f32.mrf.mxu3 }
 0x8b8   :  { %v838_v32 = vadd.f32 %v1944_v30, %v837_v31 }
 0x8ba   :  { %v840_v33 = vadd.f32 %v838_v32, %v2614_v43  ;;  %v1860_v43 = vld [vmem:[%s2882_s1 + $0x28] sm:$0xff] }
 0x8bb   :  { %931 = vmatpush.msra.mxu0 %v1860_v43 }
 0x8bc   :  { %v841_v34 = vsel %vm301_vm8, %v840_v33, 0.0 }
 0x8bd   :  { %842 = vadd.xlane.f32.xlu0 %v841_v34  ;;  %932 = vmatpush.msra.mxu0 %v1859_v44 }
 0x930   :  { %v843_v35 = vpop.xlane.xlu0 %842 }
 0x931   :  { %v844_v36 = vmul.f32 %v843_v35, %v2523_v38 }
 0x933   :  { %v845_v37 = vsub.f32 %v840_v33, %v844_v36 }
 0x935   :  { %v846_v39 = vmul.f32 %v845_v37, %v845_v37 }
 0x937   :  { %v847_v40 = vsel %vm301_vm8, %v846_v39, 0.0 }
 0x938   :  { %848 = vadd.xlane.f32.xlu2 %v847_v40 }
 0x9ab   :  { %v849_v45 = vpop.xlane.xlu2 %848 }
 0x9ac   :  { %v850_v46 = vmul.f32 %v849_v45, %v2523_v38 }
 0x9ae   :  { %v851_v47 = vadd.f32 1e-12, %v850_v46 }
 0x9b0   :  { %1973 = vrsqrt.f32 %v851_v47  ;;  %vm858_vm9 = vweird.f32 %v851_v47 }
 0x9b6   :  { %v1974_v48 = vpop.eup %1973 }
 0x9b7   :  { %v853_v49 = vmul.f32 %v1974_v48, %v851_v47  ;;  %vm859_vm7 = vweird.f32 %v1974_v48 }
 0x9b8   :  { %vm860_vm10 = vmor %vm858_vm9, %vm859_vm7 }
 0x9b9   :  { %v854_v50 = vmul.f32 %v1974_v48, %v853_v49 }
 0x9bb   :  { %v855_v51 = vmul.f32 0.5, %v854_v50 }
 0x9bd   :  { %v856_v52 = vsub.f32 1.5, %v855_v51 }
 0x9bf   :  { %v857_v53 = vmul.f32 %v1974_v48, %v856_v52 }
 0x9c1   :  { %v861_v55 = vsel %vm860_vm10, %v1974_v48, %v857_v53 }
 0x9c2   :  { %v862_v56 = vmul.f32 %v861_v55, %v845_v37 }
 0x9c4   :  { %v866_v58 = vmul.f32 %v1945_v54, %v862_v56 }
 0x9c6   :  { %v2669_v59 = vadd.f32 %v1946_v57, %v866_v58 }
 0x9c8   :  { %1880 = vmatmul.msk.f32.vlgmr.msra.gmra.mxu0 %vm301_vm8, %v2669_v59 }
 0xa45   :  { %v934_v61 = vpop.f32.mrf.mxu0 }
 0xa46   :  { %v935_v63 = vadd.f32 %v1947_v60, %v934_v61 }
 0xa48   :  { %995 = vrot.lane.b32.xlu0 %v935_v63, %s2317_s9  ;;  %939 = vrot.lane.b32.xlu2 %v935_v63, %s2315_s6  ;;  %v938_v0 = vrot.slane %v935_v63, 4 }
 0xa4a   :  { %1023 = vrot.lane.b32.xlu1 %v938_v0, %s2317_s9 }
 0xa50   :  { %965 = vrot.lane.b32.xlu2 %v938_v0, %s2315_s6 }
 0xa58   :  { %1021 = vrot.lane.b32.xlu2 %v938_v0, %s2318_s15 }
 0xa60   :  { %993 = vrot.lane.b32.xlu2 %v935_v63, %s2318_s15 }
 0xaa2   :  { %v940_v1 = vpop.permute.xlu2 %939 }
 0xaa3   :  { %1881 = vmatpush.xpose.msk.msrb.mxu1 %vm397_vm13, %v940_v1 }
 0xaa6   :  { %1882 = vmatmul.msk.f32.vlgmr.msrb.gmra.mxu1 %vm397_vm13, %v935_v63 }
 0xaaa   :  { %v966_v2 = vpop.permute.xlu2 %965 }
 0xaab   :  { %1883 = vmatpush.xpose.msk.msra.mxu2 %vm397_vm13, %v966_v2  ;;  %v1865_v2 = vld [vmem:[%s2845_s7 + $0x30] sm:$0xff] }
 0xaae   :  { %1884 = vmatmul.msk.f32.vlgmr.msra.gmra.mxu2 %vm397_vm13, %v938_v0 }
 0xab2   :  { %v1022_v3 = vpop.permute.xlu2 %1021 }
 0xaba   :  { %v996_v4 = vpop.permute.xlu0 %995  ;;  %v994_v6 = vpop.permute.xlu2 %993 }
 0xabb   :  { %1885 = vmatpush.xpose.msk.msrb.mxu0 %vm397_vm13, %v996_v4  ;;  %v1863_v4 = vld [vmem:[%s2845_s7 + $0x20] sm:$0xff] }
 0xabc   :  { %v1024_v5 = vpop.permute.xlu1 %1023 }
 0xabd   :  { %1887 = vmatpush.xpose.msk.msra.mxu1 %vm397_vm13, %v1024_v5 }
 0xabe   :  { %1886 = vmatmul.msk.f32.vlgmr.msrb.gmra.mxu0 %vm397_vm13, %v994_v6 }
 0xac0   :  { %1888 = vmatmul.msk.f32.vlgmr.msra.gmra.mxu1 %vm397_vm13, %v1022_v3  ;;  %v1864_v3 = vld [vmem:[%s2845_s7 + $0x28] sm:$0xff] }
 0xb23   :  { %v962_v7 = vpop.f32.mrf.mxu1 }
 0xb24   :  { %v991_v12 = vmul.f32 0.25, %v962_v7 }
 0xb31   :  { %v988_v10 = vpop.f32.mrf.mxu2 }
 0xb32   :  { %v992_v15 = vmul.f32 0.25, %v988_v10 }
 0xb3b   :  { %v1018_v8 = vpop.f32.mrf.mxu0 }
 0xb3c   :  { %v1049_v9 = vmul.f32 0.25, %v1018_v8 }
 0xb3d   :  { %v1046_v11 = vpop.f32.mrf.mxu1 }
 0xb3e   :  { %v1053_v13 = vrot.slane %v1049_v9, 4  ;;  %v1050_v14 = vmul.f32 0.25, %v1046_v11 }
 0xb40   :  { %v1054_v16 = vrot.slane %v1050_v14, 4  ;;  %v1057_v17 = vsel %vm291_vm4, %v991_v12, %v1053_v13  ;;  %v1948_v13 = vld [vmem:[%s2846_s8 + $0x1] ss:$0 sm:$0xff] }
 0xb41   :  { %v1059_v18 = vsel %vm516_vm14, %v1057_v17, -inf }
 0xb42   :  { %1060 = vmax.xlane.f32.xlu0 %v1059_v18  ;;  %v1058_v19 = vsel %vm291_vm4, %v992_v15, %v1054_v16 }
 0xb43   :  { %v1062_v20 = vsel %vm516_vm14, %v1058_v19, -inf }
 0xb44   :  { %1063 = vmax.xlane.f32.xlu2 %v1062_v20 }
 0xb56   :  { %1189 = vrot.lane.b32.xlu0 %v938_v0, %s2319_s30 }
 0xb5e   :  { %1107 = vrot.lane.b32.xlu0 %v935_v63, %s2313_s20 }
 0xbb5   :  { %v1061_v21 = vpop.xlane.xlu0 %1060 }
 0xbb6   :  { %v1065_v22 = vsub.f32 %v1057_v17, %v1061_v21 }
 0xbb7   :  { %v1064_v23 = vpop.xlane.xlu2 %1063 }
 0xbb8   :  { %v1067_v24 = vmul.f32 1.442695, %v1065_v22  ;;  %v1066_v25 = vsub.f32 %v1058_v19, %v1064_v23  ;;  %v893_v23 = vld [vmem:[#allocation11 + $0x38] sm:$0xff] }
 0xbba   :  { %1975 = vpow2.f32 %v1067_v24  ;;  %v1069_v26 = vmul.f32 1.442695, %v1066_v25  ;;  %v892_v24 = vld [vmem:[#allocation11 + $0x30] sm:$0xff]  ;;  %v891_v25 = vld [vmem:[#allocation11 + $0x28] sm:$0xff] }
 0xbbc   :  { %1977 = vpow2.f32 %v1069_v26  ;;  %v890_v26 = vld [vmem:[#allocation11 + $0x20] sm:$0xff] }
 0xbc0   :  { %v1976_v27 = vpop.eup %1975 }
 0xbc1   :  { %v1071_v28 = vsel %vm516_vm14, %v1976_v27, 0.0 }
 0xbc2   :  { %v1978_v62 = vpop.eup %1977  ;;  %1072 = vadd.xlane.f32.xlu2 %v1071_v28 }
 0xbc3   :  { %v1074_v29 = vsel %vm516_vm14, %v1978_v62, 0.0 }
 0xbc4   :  { %1075 = vadd.xlane.f32.xlu1 %v1074_v29 }
 0xbc8   :  { %v1190_v30 = vpop.permute.xlu0 %1189 }
 0xbc9   :  { %1895 = vmatpush.msk.msrb.mxu1 %vm291_vm4, %v1190_v30 }
 0xbd0   :  { %v1108_v31 = vpop.permute.xlu0 %1107 }
 0xbd1   :  { %1889 = vmatpush.msk.msrb.mxu2 %vm291_vm4, %v1108_v31 }
 0xbda   :  { %1134 = vrot.lane.b32.xlu2 %v938_v0, %s2313_s20 }
 0xbdd   :  { %1162 = vrot.lane.b32.xlu1 %v935_v63, %s2319_s30  ;;  %v1866_v63 = vld [vmem:[%s2845_s7 + $0x38] sm:$0xff] }
 0xbde   :  { %1247 = vmatpush.msra.mxu2 %v1866_v63  ;;  %v1872_v63 = vld [vmem:[%s2851_s13 + $0x50] sm:$0xff] }
 0xbe0   :  { %1248 = vmatpush.msra.mxu2 %v1865_v2 }
 0xbe2   :  { %1249 = vmatpush.msra.mxu2 %v1864_v3  ;;  %v1870_v3 = vld [vmem:[%s2851_s13 + $0x40] sm:$0xff] }
 0xbe4   :  { %1250 = vmatpush.msra.mxu2 %v1863_v4 }
 0xc35   :  { %v1073_v32 = vpop.xlane.xlu2 %1072 }
 0xc36   :  { %1979 = vrcp.f32 %v1073_v32  ;;  %v1088_v41 = vand.u32 2147483648, %v1073_v32  ;;  %v1086_v43 = vand.u32 2147483647, %v1073_v32  ;;  %vm1082_vm12 = vweird.f32 %v1073_v32 }
 0xc37   :  { %v1076_v33 = vpop.xlane.xlu1 %1075 }
 0xc38   :  { %1981 = vrcp.f32 %v1076_v33  ;;  %v1103_v45 = vand.u32 2147483648, %v1076_v33  ;;  %v1101_v48 = vand.u32 2147483647, %v1076_v33  ;;  %v1089_v49 = vor.u32 1.1754944e-38, %v1088_v41  ;;  %v1951_v41 = vld [vmem:[%s2850_s12 + $0x1] ss:$0 sm:$0xff] }
 0xc39   :  { %vm1087_vm3 = vcmp.eq.f32.partialorder %v1086_v43, 8.507059e+37  ;;  %vm1097_vm5 = vweird.f32 %v1076_v33 }
 0xc3a   :  { %v1104_v53 = vor.u32 1.1754944e-38, %v1103_v45  ;;  %vm1102_vm7 = vcmp.eq.f32.partialorder %v1101_v48, 8.507059e+37 }
 0xc3c   :  { %v1980_v34 = vpop.eup %1979 }
 0xc3d   :  { %v1078_v35 = vmul.f32 %v1980_v34, %v1073_v32  ;;  %v1135_v36 = vpop.permute.xlu2 %1134  ;;  %vm1083_vm11 = vweird.f32 %v1980_v34 }
 0xc3e   :  { %v1982_v37 = vpop.eup %1981  ;;  %1891 = vmatpush.msk.msra.mxu3 %vm291_vm4, %v1135_v36  ;;  %vm1084_vm2 = vmor %vm1082_vm12, %vm1083_vm11 }
 0xc3f   :  { %v1079_v39 = vsub.f32 1.0, %v1078_v35  ;;  %v1093_v40 = vmul.f32 %v1982_v37, %v1076_v33  ;;  %vm1098_vm15 = vweird.f32 %v1982_v37 }
 0xc40   :  { %vm1099_vm6 = vmor %vm1097_vm5, %vm1098_vm15  ;;  %1304 = vmatpush.msrb.mxu3 %v893_v23 }
 0xc41   :  { %v1080_v42 = vmul.f32 %v1980_v34, %v1079_v39  ;;  %v1094_v44 = vsub.f32 1.0, %v1093_v40 }
 0xc42   :  { %1305 = vmatpush.msrb.mxu3 %v892_v24 }
 0xc43   :  { %v1081_v46 = vadd.f32 %v1980_v34, %v1080_v42  ;;  %v1095_v47 = vmul.f32 %v1982_v37, %v1094_v44 }
 0xc44   :  { %1306 = vmatpush.msrb.mxu3 %v891_v25 }
 0xc45   :  { %v1085_v50 = vsel %vm1084_vm2, %v1980_v34, %v1081_v46  ;;  %v1096_v51 = vadd.f32 %v1982_v37, %v1095_v47  ;;  %v1949_v34 = vld [vmem:[#allocation10 + $0x1] ss:$0 sm:$0xff]  ;;  %v1877_v47 = vld [vmem:[%s2851_s13 + $0x78] sm:$0xff] }
 0xc46   :  { %v1090_v52 = vsel %vm1087_vm3, %v1089_v49, %v1085_v50  ;;  %1307 = vmatpush.msrb.mxu3 %v890_v26  ;;  %v1876_v50 = vld [vmem:[%s2851_s13 + $0x70] sm:$0xff] }
 0xc47   :  { %v1100_v54 = vsel %vm1099_vm6, %v1982_v37, %v1096_v51  ;;  %v1091_v55 = vmul.f32 %v1976_v27, %v1090_v52  ;;  %v1950_v37 = vld [vmem:[%s2848_s10 + $0x1] ss:$0 sm:$0xff] }
 0xc48   :  { %v1105_v56 = vsel %vm1102_vm7, %v1104_v53, %v1100_v54  ;;  %v1875_v53 = vld [vmem:[%s2851_s13 + $0x68] sm:$0xff] }
 0xc49   :  { %1890 = vmatmul.msk.f32.vlgmr.msrb.gmra.mxu2 %vm516_vm14, %v1091_v55  ;;  %v1106_v57 = vmul.f32 %v1978_v62, %v1105_v56  ;;  %v1161_v61 = vrot.slane %v1091_v55, 4  ;;  %v1874_v56 = vld [vmem:[%s2851_s13 + $0x60] sm:$0xff] }
 0xc4b   :  { %1892 = vmatmul.msk.f32.vlgmr.msra.gmra.mxu3 %vm516_vm14, %v1106_v57  ;;  %v1188_v58 = vrot.slane %v1106_v57, 4 }
 0xc4d   :  { %1896 = vmatmul.msk.f32.vlgmr.msrb.gmra.mxu1 %vm516_vm14, %v1188_v58  ;;  %v1873_v58 = vld [vmem:[%s2851_s13 + $0x58] sm:$0xff] }
 0xc4f   :  { %v1163_v60 = vpop.permute.xlu1 %1162 }
 0xc50   :  { %1893 = vmatpush.msk.msra.mxu0 %vm291_vm4, %v1163_v60 }
 0xc51   :  { %1894 = vmatmul.msk.f32.vlgmr.msra.gmra.mxu0 %vm516_vm14, %v1161_v61 }
 0xc52   :  { %1370 = vmatpush.msrb.mxu0 %v1877_v47 }
 0xc54   :  { %1371 = vmatpush.msrb.mxu0 %v1876_v50 }
 0xc56   :  { %1372 = vmatpush.msrb.mxu0 %v1875_v53 }
 0xc58   :  { %1373 = vmatpush.msrb.mxu0 %v1874_v56 }
 0xc5a   :  { %1374 = vmatpush.msrb.mxu0 %v1873_v58 }
 0xc5c   :  { %1375 = vmatpush.msrb.mxu0 %v1872_v63 }
 0xcca   :  { %v1212_v0 = vpop.f32.mrf.mxu1 }
 0xccb   :  { %1219 = vrot.lane.b32.xlu1 %v1212_v0, %s2879_s23 }
 0xccc   :  { %v1131_v8 = vpop.f32.mrf.mxu2 }
 0xcce   :  { %v1185_v1 = vpop.f32.mrf.mxu0  ;;  %v1158_v5 = vpop.f32.mrf.mxu3 }
 0xccf   :  { %1217 = vrot.lane.b32.xlu0 %v1185_v1, %s2879_s23  ;;  %v1871_v1 = vld [vmem:[%s2851_s13 + $0x48] sm:$0xff] }
 0xcd0   :  { %1376 = vmatpush.msrb.mxu0 %v1871_v1 }
 0xcd2   :  { %1377 = vmatpush.msrb.mxu0 %v1870_v3 }
 0xd3d   :  { %v1220_v6 = vpop.permute.xlu1 %1219 }
 0xd3e   :  { %v1224_v7 = vsel %vm397_vm13, %v1158_v5, %v1220_v6 }
 0xd3f   :  { %v1226_v9 = vrot.slane %v1224_v7, 4 }
 0xd41   :  { %v1218_v10 = vpop.permute.xlu0 %1217 }
 0xd42   :  { %v1223_v11 = vsel %vm397_vm13, %v1131_v8, %v1218_v10 }
 0xd43   :  { %v1228_v12 = vsel %vm291_vm4, %v1223_v11, %v1226_v9 }
 0xd44   :  { %1897 = vmatmul.msk.f32.vlgmr.msra.gmra.mxu2 %vm301_vm8, %v1228_v12 }
 0xdc7   :  { %v1252_v14 = vpop.f32.mrf.mxu2 }
 0xdc8   :  { %v1253_v15 = vadd.f32 %v1948_v13, %v1252_v14 }
 0xdca   :  { %v1255_v16 = vadd.f32 %v1253_v15, %v2669_v59 }
 0xdcc   :  { %v1256_v17 = vsel %vm301_vm8, %v1255_v16, 0.0 }
 0xdcd   :  { %1257 = vadd.xlane.f32.xlu2 %v1256_v17 }
 0xe40   :  { %v1258_v18 = vpop.xlane.xlu2 %1257 }
 0xe41   :  { %v1259_v19 = vmul.f32 %v1258_v18, %v2523_v38 }
 0xe43   :  { %v1260_v20 = vsub.f32 %v1255_v16, %v1259_v19 }
 0xe45   :  { %v1261_v21 = vmul.f32 %v1260_v20, %v1260_v20 }
 0xe47   :  { %v1262_v22 = vsel %vm301_vm8, %v1261_v21, 0.0 }
 0xe48   :  { %1263 = vadd.xlane.f32.xlu1 %v1262_v22 }
 0xebb   :  { %v1264_v59 = vpop.xlane.xlu1 %1263 }
 0xebc   :  { %v1265_v27 = vmul.f32 %v1264_v59, %v2523_v38 }
 0xebe   :  { %v1266_v28 = vadd.f32 1e-12, %v1265_v27 }
 0xec0   :  { %1983 = vrsqrt.f32 %v1266_v28  ;;  %vm1273_vm14 = vweird.f32 %v1266_v28 }
 0xec6   :  { %v1984_v62 = vpop.eup %1983 }
 0xec7   :  { %v1268_v29 = vmul.f32 %v1984_v62, %v1266_v28  ;;  %vm1274_vm4 = vweird.f32 %v1984_v62  ;;  %v1952_v28 = vld [vmem:[%s2852_s14 + $0x1] ss:$0 sm:$0xff] }
 0xec8   :  { %vm1275_vm9 = vmor %vm1273_vm14, %vm1274_vm4 }
 0xec9   :  { %v1269_v30 = vmul.f32 %v1984_v62, %v1268_v29 }
 0xecb   :  { %v1270_v31 = vmul.f32 0.5, %v1269_v30 }
 0xecd   :  { %v1271_v32 = vsub.f32 1.5, %v1270_v31 }
 0xecf   :  { %v1272_v33 = vmul.f32 %v1984_v62, %v1271_v32 }
 0xed1   :  { %v1276_v35 = vsel %vm1275_vm9, %v1984_v62, %v1272_v33 }
 0xed2   :  { %v1277_v36 = vmul.f32 %v1276_v35, %v1260_v20 }
 0xed4   :  { %v1281_v39 = vmul.f32 %v1949_v34, %v1277_v36 }
 0xed6   :  { %v2734_v40 = vadd.f32 %v1950_v37, %v1281_v39  ;;  %v1416_v37 = vld [vmem:[#allocation14 + $0x18] sm:$0xff]  ;;  %v1415_v39 = vld [vmem:[#allocation14 + $0x10] sm:$0xff] }
 0xed7   :  { %1436 = vmatpush.msra.mxu1 %v1416_v37 }
 0xed8   :  { %1898 = vmatmul.msk.f32.vlgmr.msrb.gmra.mxu3 %vm301_vm8, %v2734_v40 }
 0xed9   :  { %1437 = vmatpush.msra.mxu1 %v1415_v39 }
 0xf5b   :  { %v1309_v42 = vpop.f32.mrf.mxu3 }
 0xf5c   :  { %v1310_v43 = vadd.f32 %v1951_v41, %v1309_v42  ;;  %v2773_v41 = vld [vmem:[#allocation16 + $0x8] sm:$0xff] }
 0xf5d   :  { %v1414_v42 = vld [vmem:[#allocation14 + $0x8] sm:$0xff]  ;;  %1488 = vmatpush.msrb.mxu2 %v2773_v41  ;;  %1551 = vmatpush.msra.mxu3 %v2773_v41 }
 0xf5e   :  { %v1313_v44 = vmul.f32 0.70710677, %v1310_v43  ;;  %v1312_v26 = vmul.f32 0.5, %v1310_v43  ;;  %v2775_v43 = vld [vmem:[#allocation16] sm:$0xff]  ;;  %1438 = vmatpush.msra.mxu1 %v1414_v42 }
 0xf5f   :  { %1489 = vmatpush.msrb.mxu2 %v2775_v43  ;;  %1552 = vmatpush.msra.mxu3 %v2775_v43 }
 0xf60   :  { %v1314_v45 = vmul.f32 %v1313_v44, %v1313_v44 }
 0xf61   :  { %1654 = vmatpush.msrb.mxu3 %v2773_v41 }
 0xf62   :  { %v1315_v46 = vmin.f32 %v1314_v45, 16.0 }
 0xf63   :  { %1655 = vmatpush.msrb.mxu3 %v2775_v43 }
 0xf64   :  { %v1316_v48 = vmul.f32 2.1237322e-06, %v1315_v46  ;;  %v1327_v49 = vmul.f32 3.8918573e-05, %v1315_v46 }
 0xf66   :  { %v1317_v51 = vadd.f32 0.00028619796, %v1316_v48  ;;  %v1328_v52 = vadd.f32 0.001143296, %v1327_v49 }
 0xf68   :  { %v1318_v54 = vmul.f32 %v1317_v51, %v1315_v46  ;;  %v1329_v55 = vmul.f32 %v1328_v52, %v1315_v46 }
 0xf6a   :  { %v1330_v57 = vadd.f32 0.014752088, %v1329_v55  ;;  %v1319_v60 = vadd.f32 0.0036580483, %v1318_v54  ;;  %v1953_v54 = vld [vmem:[#allocation13 + $0x1] ss:$0 sm:$0xff] }
 0xf6c   :  { %v1331_v61 = vmul.f32 %v1330_v57, %v1315_v46  ;;  %v1320_v2 = vmul.f32 %v1319_v60, %v1315_v46  ;;  %v1954_v57 = vld [vmem:[%s2854_s16 + $0x1] ss:$0 sm:$0xff]  ;;  %v1955_v60 = vld [vmem:[%s2857_s19] ss:$0 sm:$0xff] }
 0xf6e   :  { %v1332_v0 = vadd.f32 0.112945676, %v1331_v61  ;;  %v1321_v6 = vadd.f32 0.05243302, %v1320_v2 }
 0xf70   :  { %v1333_v4 = vmul.f32 %v1332_v0, %v1315_v46  ;;  %v1322_v9 = vmul.f32 %v1321_v6, %v1315_v46 }
 0xf72   :  { %v1334_v5 = vadd.f32 0.4994258, %v1333_v4  ;;  %v1323_v10 = vadd.f32 0.18741608, %v1322_v9 }
 0xf74   :  { %v1335_v7 = vmul.f32 %v1334_v5, %v1315_v46  ;;  %v1324_v12 = vmul.f32 %v1323_v10, %v1315_v46 }
 0xf76   :  { %v1336_v8 = vadd.f32 1.0, %v1335_v7  ;;  %v1325_v16 = vadd.f32 1.1283791, %v1324_v12 }
 0xf78   :  { %1985 = vrcp.f32 %v1336_v8  ;;  %v1348_v15 = vand.u32 2147483648, %v1336_v8  ;;  %v1346_v18 = vand.u32 2147483647, %v1336_v8  ;;  %vm1342_vm11 = vweird.f32 %v1336_v8 }
 0xf79   :  { %v1326_v21 = vmul.f32 %v1325_v16, %v1313_v44  ;;  %v2320_v44 = vmov 0.0  }
 0xf7a   :  { %v1349_v20 = vor.u32 1.1754944e-38, %v1348_v15  ;;  %vm1347_vm15 = vcmp.eq.f32.partialorder %v1346_v18, 8.507059e+37  ;;  %1490 = vmatmul.f32.vlgmr.msrb.gmra.mxu2 %v2320_v44 }
 0xf7e   :  { %v1986_v11 = vpop.eup %1985 }
 0xf7f   :  { %v1338_v13 = vmul.f32 %v1986_v11, %v1336_v8  ;;  %vm1343_vm10 = vweird.f32 %v1986_v11 }
 0xf80   :  { %vm1344_vm12 = vmor %vm1342_vm11, %vm1343_vm10 }
 0xf81   :  { %v1339_v14 = vsub.f32 1.0, %v1338_v13 }
 0xf83   :  { %v1340_v17 = vmul.f32 %v1986_v11, %v1339_v14 }
 0xf85   :  { %v1341_v19 = vadd.f32 %v1986_v11, %v1340_v17 }
 0xf87   :  { %v1345_v22 = vsel %vm1344_vm12, %v1986_v11, %v1341_v19 }
 0xf88   :  { %v1350_v23 = vsel %vm1347_vm15, %v1349_v20, %v1345_v22 }
 0xf89   :  { %v1351_v24 = vmul.f32 %v1350_v23, %v1326_v21 }
 0xf8b   :  { %v1899_v25 = vclamps-f32 %v1351_v24, 1.0 }
 0xf8d   :  { %v1354_v59 = vadd.f32 1.0, %v1899_v25 }
 0xf8f   :  { %v1355_v27 = vmul.f32 %v1354_v59, %v1312_v26  ;;  %v1464_v26 = vld [vmem:[#allocation17 + $0x8] sm:$0xff]  ;;  %v1463_v59 = vld [vmem:[#allocation17] sm:$0xff] }
 0xf90   :  { %1634 = vmatpush.msra.mxu2 %v1464_v26 }
 0xf91   :  { %1900 = vmatmul.msk.f32.vlgmr.msrb.gmra.mxu0 %vm235_vm0, %v1355_v27 }
 0xf92   :  { %1635 = vmatpush.msra.mxu2 %v1463_v59 }
 0xffd   :  { %v1491_v1 = vpop.f32.mrf.mxu2 }
0x100e   :  { %v1379_v62 = vpop.f32.mrf.mxu0 }
0x100f   :  { %v1380_v29 = vadd.f32 %v1952_v28, %v1379_v62 }
0x1011   :  { %v1382_v30 = vadd.f32 %v1380_v29, %v2734_v40  ;;  %v1413_v40 = vld [vmem:[#allocation14] sm:$0xff] }
0x1012   :  { %1439 = vmatpush.msra.mxu1 %v1413_v40 }
0x1013   :  { %v1383_v31 = vsel %vm301_vm8, %v1382_v30, 0.0 }
0x1014   :  { %1384 = vadd.xlane.f32.xlu0 %v1383_v31 }
0x1087   :  { %v1385_v32 = vpop.xlane.xlu0 %1384 }
0x1088   :  { %v1386_v33 = vmul.f32 %v1385_v32, %v2523_v38 }
0x108a   :  { %v1387_v34 = vsub.f32 %v1382_v30, %v1386_v33 }
0x108c   :  { %v1388_v35 = vmul.f32 %v1387_v34, %v1387_v34 }
0x108e   :  { %v1389_v36 = vsel %vm301_vm8, %v1388_v35, 0.0 }
0x108f   :  { %1390 = vadd.xlane.f32.xlu2 %v1389_v36 }
0x1102   :  { %v1391_v45 = vpop.xlane.xlu2 %1390 }
0x1103   :  { %v1392_v46 = vmul.f32 %v1391_v45, %v2523_v38 }
0x1105   :  { %v1393_v47 = vadd.f32 1e-12, %v1392_v46 }
0x1107   :  { %1987 = vrsqrt.f32 %v1393_v47  ;;  %vm1400_vm2 = vweird.f32 %v1393_v47 }
0x110d   :  { %v1988_v48 = vpop.eup %1987 }
0x110e   :  { %v1395_v49 = vmul.f32 %v1988_v48, %v1393_v47  ;;  %vm1401_vm0 = vweird.f32 %v1988_v48 }
0x110f   :  { %vm1402_vm3 = vmor %vm1400_vm2, %vm1401_vm0 }
0x1110   :  { %v1396_v50 = vmul.f32 %v1988_v48, %v1395_v49 }
0x1112   :  { %v1397_v51 = vmul.f32 0.5, %v1396_v50 }
0x1114   :  { %v1398_v52 = vsub.f32 1.5, %v1397_v51 }
0x1116   :  { %v1399_v53 = vmul.f32 %v1988_v48, %v1398_v52 }
0x1118   :  { %v1403_v55 = vsel %vm1402_vm3, %v1988_v48, %v1399_v53 }
0x1119   :  { %v1404_v56 = vmul.f32 %v1403_v55, %v1387_v34 }
0x111b   :  { %v1408_v58 = vmul.f32 %v1953_v54, %v1404_v56 }
0x111d   :  { %v1412_v38 = vadd.f32 %v1954_v57, %v1408_v58  ;;  %v1466_v57 = vld [vmem:[#allocation17 + $0x18] sm:$0xff]  ;;  %v1465_v58 = vld [vmem:[#allocation17 + $0x10] sm:$0xff] }
0x111e   :  { %1614 = vmatpush.msrb.mxu1 %v1466_v57 }
0x111f   :  { %1901 = vmatmul.msk.f32.vlgmr.msra.gmra.mxu1 %vm301_vm8, %v1412_v38 }
0x1120   :  { %1615 = vmatpush.msrb.mxu1 %v1465_v58 }
0x1122   :  { %1738 = vmatpush.msra.mxu1 %v2773_v41 }
0x1124   :  { %1739 = vmatpush.msra.mxu1 %v2775_v43 }
0x119c   :  { %v1441_v61 = vpop.f32.mrf.mxu1 }
0x119d   :  { %v2791_v63 = vadd.f32 %v1955_v60, %v1441_v61 }
0x119f   :  { %v1445_v0 = vrot.slane %v2791_v63, 3  ;;  %v1458_v2 = vrot.slane %v2791_v63, 6  ;;  %v1448_v29 = vrot.slane %v2791_v63, 1  ;;  %v1450_v30 = vrot.slane %v2791_v63, 4 }
0x11a1   :  { %v1447_v3 = vsel %vm285_vm1, %v2791_v63, %v1445_v0  ;;  %v2798_v5 = vsel %vm285_vm1, %v1445_v0, %v1458_v2  ;;  %v1452_v31 = vsel %vm285_vm1, %v1448_v29, %v1450_v30  ;;  %v1453_v0 = vrot.slane %v2791_v63, 2 }
0x11a2   :  { %v1494_v4 = vadd.f32 %v1491_v1, %v1447_v3  ;;  %v1455_v1 = vrot.slane %v2791_v63, 5 }
0x11a4   :  { %1989 = vtanh.f32 %v1494_v4  ;;  %v1902_v7 = vmul.f32 -1.442695, %v1494_v4  ;;  %v1457_v2 = vsel %vm285_vm1, %v1453_v0, %v1455_v1 }
0x11a6   :  { %1991 = vpow2.f32 %v1902_v7 }
0x11aa   :  { %v1990_v6 = vpop.eup %1989 }
0x11ab   :  { %1517 = vrot.lane.b32.xlu1 %v1990_v6, %s2317_s9 }
0x11ac   :  { %v1992_v8 = vpop.eup %1991 }
0x11ad   :  { %v1498_v9 = vadd.f32 1.0, %v1992_v8 }
0x11af   :  { %1993 = vrcp.f32 %v1498_v9  ;;  %v1510_v15 = vand.u32 2147483648, %v1498_v9  ;;  %vm1504_vm5 = vweird.f32 %v1498_v9  ;;  %v1508_v16 = vand.u32 2147483647, %v1498_v9 }
0x11b1   :  { %v1511_v18 = vor.u32 1.1754944e-38, %v1510_v15  ;;  %vm1509_vm7 = vcmp.eq.f32.partialorder %v1508_v16, 8.507059e+37 }
0x11b5   :  { %v1994_v10 = vpop.eup %1993 }
0x11b6   :  { %v1500_v11 = vmul.f32 %v1994_v10, %v1498_v9  ;;  %vm1505_vm8 = vweird.f32 %v1994_v10 }
0x11b7   :  { %vm1506_vm6 = vmor %vm1504_vm5, %vm1505_vm8  ;;  %vm1813_vm5 = vcmask 517120  }
0x11b8   :  { %v1501_v12 = vsub.f32 1.0, %v1500_v11 }
0x11ba   :  { %v1502_v13 = vmul.f32 %v1994_v10, %v1501_v12 }
0x11bc   :  { %v1503_v14 = vadd.f32 %v1994_v10, %v1502_v13 }
0x11be   :  { %v1507_v17 = vsel %vm1506_vm6, %v1994_v10, %v1503_v14 }
0x11bf   :  { %v1512_v20 = vsel %vm1509_vm7, %v1511_v18, %v1507_v17 }
0x11c0   :  { %v1515_v22 = vmul.f32 0.0, %v1512_v20 }
0x121d   :  { %v1518_v19 = vpop.permute.xlu1 %1517 }
0x121e   :  { %v1520_v21 = vmul.f32 %v1518_v19, %v1512_v20 }
0x1220   :  { %1522 = vrot.lane.b32.xlu2 %v1520_v21, %s2879_s23 }
0x127a   :  { %v1523_v23 = vpop.permute.xlu2 %1522 }
0x127b   :  { %v1525_v24 = vadd.f32 %v1523_v23, %v1515_v22  ;;  %v1468_v23 = vld [vmem:[#allocation17 + $0x28] sm:$0xff] }
0x127c   :  { %1717 = vmatpush.msra.mxu0 %v1468_v23 }
0x127d   :  { %1995 = vtanh.f32 %v1525_v24 }
0x1283   :  { %v1996_v25 = vpop.eup %1995 }
0x1284   :  { %1528 = vrot.lane.b32.xlu0 %v1996_v25, %s2879_s23 }
0x12f6   :  { %v1529_v27 = vpop.permute.xlu0 %1528 }
0x12f7   :  { %v1531_v28 = vmul.f32 %v1529_v27, %v1512_v20 }
0x12f9   :  { %1533 = vrot.lane.b32.xlu0 %v1531_v28, %s2315_s6 }
0x136b   :  { %v1534_v62 = vpop.permute.xlu0 %1533 }
0x136c   :  { %1903 = vmatmul.msk.f32.vlgmr.msra.gmra.mxu3 %vm397_vm13, %v1534_v62  ;;  %1906 = vmatmul.msk.f32.vlgmr.msra.gmra.mxu2 %vm397_vm13, %v1534_v62 }
0x13ef   :  { %v1554_v32 = vpop.f32.mrf.mxu3 }
0x13f0   :  { %v1557_v33 = vadd.f32 %v1554_v32, %v1452_v31 }
0x13f2   :  { %1997 = vtanh.f32 %v1557_v33  ;;  %v1904_v35 = vmul.f32 -1.442695, %v1557_v33 }
0x13f4   :  { %1999 = vpow2.f32 %v1904_v35 }
0x13f8   :  { %v1998_v34 = vpop.eup %1997 }
0x13f9   :  { %1580 = vrot.lane.b32.xlu2 %v1998_v34, %s2317_s9 }
0x13fa   :  { %v2000_v36 = vpop.eup %1999 }
0x13fb   :  { %v1561_v37 = vadd.f32 1.0, %v2000_v36 }
0x13fd   :  { %2001 = vrcp.f32 %v1561_v37  ;;  %v1573_v46 = vand.u32 2147483648, %v1561_v37  ;;  %vm1567_vm14 = vweird.f32 %v1561_v37  ;;  %v1571_v47 = vand.u32 2147483647, %v1561_v37 }
0x13ff   :  { %v1574_v49 = vor.u32 1.1754944e-38, %v1573_v46  ;;  %vm1572_vm10 = vcmp.eq.f32.partialorder %v1571_v47, 8.507059e+37 }
0x1403   :  { %v2002_v39 = vpop.eup %2001 }
0x1404   :  { %v1563_v42 = vmul.f32 %v2002_v39, %v1561_v37  ;;  %vm1568_vm4 = vweird.f32 %v2002_v39 }
0x1405   :  { %vm1569_vm9 = vmor %vm1567_vm14, %vm1568_vm4 }
0x1406   :  { %v1564_v40 = vsub.f32 1.0, %v1563_v42 }
0x1408   :  { %v1565_v44 = vmul.f32 %v2002_v39, %v1564_v40 }
0x140a   :  { %v1566_v45 = vadd.f32 %v2002_v39, %v1565_v44 }
0x140c   :  { %v1570_v48 = vsel %vm1569_vm9, %v2002_v39, %v1566_v45 }
0x140d   :  { %v1575_v51 = vsel %vm1572_vm10, %v1574_v49, %v1570_v48 }
0x140e   :  { %v1578_v53 = vmul.f32 %v1575_v51, %v1525_v24  ;;  %v1467_v24 = vld [vmem:[#allocation17 + $0x20] sm:$0xff] }
0x140f   :  { %1718 = vmatpush.msra.mxu0 %v1467_v24 }
0x1453   :  { %v1581_v50 = vpop.permute.xlu2 %1580 }
0x1454   :  { %v1583_v52 = vmul.f32 %v1581_v50, %v1575_v51 }
0x1456   :  { %1585 = vrot.lane.b32.xlu1 %v1583_v52, %s2879_s23  ;;  %v1469_v52 = vld [vmem:[#allocation17 + $0x30] sm:$0xff] }
0x14c8   :  { %v1586_v54 = vpop.permute.xlu1 %1585 }
0x14c9   :  { %v1588_v55 = vadd.f32 %v1586_v54, %v1578_v53 }
0x14cb   :  { %2003 = vtanh.f32 %v1588_v55 }
0x14d1   :  { %v2004_v56 = vpop.eup %2003 }
0x14d2   :  { %1591 = vrot.lane.b32.xlu0 %v2004_v56, %s2879_s23  ;;  %v1637_v56 = vpop.f32.mrf.mxu2 }
0x1544   :  { %v1592_v38 = vpop.permute.xlu0 %1591 }
0x1545   :  { %v1594_v60 = vmul.f32 %v1592_v38, %v1575_v51  ;;  %v1470_v51 = vld [vmem:[#allocation17 + $0x38] sm:$0xff] }
0x1546   :  { %1801 = vmatpush.msrb.mxu2 %v1470_v51 }
0x1547   :  { %1596 = vrot.lane.b32.xlu2 %v1594_v60, %s2315_s6  ;;  %v1956_v60 = vld [vmem:[%s2859_s21] ss:$0 sm:$0xff] }
0x1548   :  { %1802 = vmatpush.msrb.mxu2 %v1469_v52 }
0x15a1   :  { %v1597_v61 = vpop.permute.xlu2 %1596 }
0x15a2   :  { %1905 = vmatmul.msk.f32.vlgmr.msrb.gmra.mxu1 %vm397_vm13, %v1597_v61  ;;  %1907 = vmatmul.msk.f32.vlgmr.msrb.gmra.mxu3 %vm397_vm13, %v1597_v61 }
0x161f   :  { %v1617_v27 = vpop.f32.mrf.mxu1 }
0x1620   :  { %v1638_v58 = vadd.f32 %v1637_v56, %v1617_v27 }
0x1625   :  { %v1657_v3 = vpop.f32.mrf.mxu3 }
0x1626   :  { %v1660_v4 = vadd.f32 %v1657_v3, %v1457_v2 }
0x1628   :  { %2005 = vtanh.f32 %v1660_v4  ;;  %v1908_v43 = vmul.f32 -1.442695, %v1660_v4 }
0x162a   :  { %2007 = vpow2.f32 %v1908_v43 }
0x162e   :  { %v2006_v41 = vpop.eup %2005 }
0x162f   :  { %1683 = vrot.lane.b32.xlu1 %v2006_v41, %s2317_s9 }
0x1630   :  { %v2008_v6 = vpop.eup %2007 }
0x1631   :  { %v1664_v7 = vadd.f32 1.0, %v2008_v6 }
0x1633   :  { %2009 = vrcp.f32 %v1664_v7  ;;  %v1676_v63 = vand.u32 2147483648, %v1664_v7  ;;  %vm1670_vm12 = vweird.f32 %v1664_v7  ;;  %v1674_v13 = vand.u32 2147483647, %v1664_v7 }
0x1635   :  { %v1677_v15 = vor.u32 1.1754944e-38, %v1676_v63  ;;  %vm1675_vm15 = vcmp.eq.f32.partialorder %v1674_v13, 8.507059e+37 }
0x1639   :  { %v2010_v8 = vpop.eup %2009 }
0x163a   :  { %v1666_v9 = vmul.f32 %v2010_v8, %v1664_v7  ;;  %vm1671_vm11 = vweird.f32 %v2010_v8 }
0x163b   :  { %vm1672_vm1 = vmor %vm1670_vm12, %vm1671_vm11 }
0x163c   :  { %v1667_v10 = vsub.f32 1.0, %v1666_v9 }
0x163e   :  { %v1668_v11 = vmul.f32 %v2010_v8, %v1667_v10 }
0x1640   :  { %v1669_v12 = vadd.f32 %v2010_v8, %v1668_v11 }
0x1642   :  { %v1673_v14 = vsel %vm1672_vm1, %v2010_v8, %v1669_v12 }
0x1643   :  { %v1678_v17 = vsel %vm1675_vm15, %v1677_v15, %v1673_v14 }
0x1644   :  { %v1681_v19 = vmul.f32 %v1678_v17, %v1588_v55 }
0x16a1   :  { %v1684_v16 = vpop.permute.xlu1 %1683 }
0x16a2   :  { %v1686_v18 = vmul.f32 %v1684_v16, %v1678_v17 }
0x16a4   :  { %1688 = vrot.lane.b32.xlu0 %v1686_v18, %s2879_s23 }
0x1716   :  { %v1689_v20 = vpop.permute.xlu0 %1688 }
0x1717   :  { %v1691_v21 = vadd.f32 %v1689_v20, %v1681_v19 }
0x1719   :  { %2011 = vtanh.f32 %v1691_v21 }
0x171f   :  { %v2012_v22 = vpop.eup %2011 }
0x1720   :  { %1694 = vrot.lane.b32.xlu2 %v2012_v22, %s2879_s23 }
0x177a   :  { %v1695_v25 = vpop.permute.xlu2 %1694 }
0x177b   :  { %v1697_v26 = vmul.f32 %v1695_v25, %v1678_v17 }
0x177d   :  { %1699 = vrot.lane.b32.xlu1 %v1697_v26, %s2315_s6 }
0x17ef   :  { %v1700_v59 = vpop.permute.xlu1 %1699 }
0x17f0   :  { %1909 = vmatmul.msk.f32.vlgmr.msra.gmra.mxu0 %vm397_vm13, %v1700_v59  ;;  %1910 = vmatmul.msk.f32.vlgmr.msra.gmra.mxu1 %vm397_vm13, %v1700_v59 }
0x186d   :  { %v1741_v28 = vpop.f32.mrf.mxu1  ;;  %v1720_v57 = vpop.f32.mrf.mxu0 }
0x186e   :  { %v1744_v62 = vadd.f32 %v1741_v28, %v2798_v5  ;;  %v1723_v38 = vadd.f32 %v1720_v57, %v1638_v58 }
0x1870   :  { %2013 = vtanh.f32 %v1744_v62  ;;  %v1911_v30 = vmul.f32 -1.442695, %v1744_v62 }
0x1872   :  { %2015 = vpow2.f32 %v1911_v30 }
0x1876   :  { %v2014_v29 = vpop.eup %2013 }
0x1877   :  { %1767 = vrot.lane.b32.xlu0 %v2014_v29, %s2317_s9 }
0x1878   :  { %v2016_v31 = vpop.eup %2015 }
0x1879   :  { %v1748_v32 = vadd.f32 1.0, %v2016_v31 }
0x187b   :  { %2017 = vrcp.f32 %v1748_v32  ;;  %v1760_v39 = vand.u32 2147483648, %v1748_v32  ;;  %vm1754_vm2 = vweird.f32 %v1748_v32  ;;  %v1758_v42 = vand.u32 2147483647, %v1748_v32 }
0x187d   :  { %v1761_v40 = vor.u32 1.1754944e-38, %v1760_v39  ;;  %vm1759_vm8 = vcmp.eq.f32.partialorder %v1758_v42, 8.507059e+37 }
0x1881   :  { %v2018_v33 = vpop.eup %2017 }
0x1882   :  { %v1750_v34 = vmul.f32 %v2018_v33, %v1748_v32  ;;  %vm1755_vm0 = vweird.f32 %v2018_v33 }
0x1883   :  { %vm1756_vm3 = vmor %vm1754_vm2, %vm1755_vm0 }
0x1884   :  { %v1751_v35 = vsub.f32 1.0, %v1750_v34 }
0x1886   :  { %v1752_v36 = vmul.f32 %v2018_v33, %v1751_v35 }
0x1888   :  { %v1753_v37 = vadd.f32 %v2018_v33, %v1752_v36 }
0x188a   :  { %v1757_v5 = vsel %vm1756_vm3, %v2018_v33, %v1753_v37 }
0x188b   :  { %v1762_v45 = vsel %vm1759_vm8, %v1761_v40, %v1757_v5 }
0x188c   :  { %v1765_v47 = vmul.f32 %v1762_v45, %v1691_v21 }
0x18e9   :  { %v1768_v44 = vpop.permute.xlu0 %1767 }
0x18ea   :  { %v1770_v46 = vmul.f32 %v1768_v44, %v1762_v45 }
0x18ec   :  { %1772 = vrot.lane.b32.xlu2 %v1770_v46, %s2879_s23 }
0x1946   :  { %v1773_v48 = vpop.permute.xlu2 %1772 }
0x1947   :  { %v1775_v49 = vadd.f32 %v1773_v48, %v1765_v47 }
0x1949   :  { %2019 = vtanh.f32 %v1775_v49 }
0x194f   :  { %v2020_v50 = vpop.eup %2019 }
0x1950   :  { %1778 = vrot.lane.b32.xlu1 %v2020_v50, %s2879_s23  ;;  %s2321_s23 = smov [#allocation19]  }
0x1951   :  { %s1820_s9 = sshll.u32 %s2321_s23, 4  ;;  %s1821_s9 = int_to_ptr.vmem [resolvable:$true] %s1820_s9 }
0x19c2   :  { %v1779_v53 = vpop.permute.xlu1 %1778 }
0x19c3   :  { %v1781_v54 = vmul.f32 %v1779_v53, %v1762_v45 }
0x19c5   :  { %1783 = vrot.lane.b32.xlu0 %v1781_v54, %s2315_s6 }
0x1a37   :  { %v1784_v55 = vpop.permute.xlu0 %1783 }
0x1a38   :  { %1912 = vmatmul.msk.f32.vlgmr.msrb.gmra.mxu2 %vm397_vm13, %v1784_v55 }
0x1abb   :  { %v1804_v61 = vpop.f32.mrf.mxu2 }
0x1abc   :  { %v1807_v0 = vadd.f32 %v1804_v61, %v1723_v38 }
0x1abe   :  { %v1812_v1 = vadd.f32 %v1956_v60, %v1807_v0 }
0x1ac0   :  { %1814 = vst.msk [vmem:[#allocation19] sm:$0x3] %vm1813_vm5, %v1812_v1 }
0x1ac1   :  { %1825 = dma.vmem_to_hbm [thread:$0]  %s1821_s9, 32, %s1823_s5, [#allocation4]  }
0x1ac2   :  { %2297 = dma.done.wait [#allocation4], 32  }
0x1ac3   :  { %2298 = vsyncadd [#allocation4], 4294967264 }
0x1ac4   :  { %1830 = vsyncpa [#allocation3], 1 }
0x1ac5   :  { %1831 = vsyncpa [#allocation6], 1 }
0x1ac6   :  { %1832 = vsyncpa [#allocation9], 1 }
0x1ac7   :  { %1833 = vsyncpa [#allocation12], 1 }
0x1ac8   :  { %1834 = vsyncpa [#allocation15], 1 }
0x1ac9   :  { %1835 = vsyncpa [#allocation18], 1 }
0x1aca   :  { %1836 = vsyncpa [#allocation4], 1 }

</bundles_post_ra>
